<compile_context>
chip_gen: v6e
topology: v6e:2x2x1
jax: 0.10.0
libtpu: 0.0.40
codegen_flags: <defaults>
</compile_context>

<pallas_src>
import jax
import jax.numpy as jnp
import numpy as np
from jax import lax
from jax.experimental import pallas as pl
from jax.experimental.pallas import tpu as pltpu


def _round_up(x, m):
    return ((x + m - 1) // m) * m


def distribute_channels(total_channels, num_splits):
    """Mirror of SplitResnet.distribute_channels."""
    base = total_channels // num_splits
    rem = total_channels % num_splits
    out = [base] * num_splits
    for i in range(rem):
        out[i] += 1
    return out


def _make_conv_kernel(H_out, W_out, KH, KW):
    """In-kernel "im2col": KH*KW shifted K=Cin matmuls into an f32 VMEM accumulator."""

    def kernel(x_ref, w_ref, b_ref, o_ref, acc_ref):
        # x_ref  : (1, H_out+KH-1, W_out+KW-1, Cin_p)  padded activation (compute dtype)
        # w_ref  : (KH, KW, Cin_p, tile_n)             weights (compute dtype)
        # b_ref  : (1, tile_n)                         bias (f32)
        # o_ref  : (1, H_out, W_out, tile_n)           output
        # acc_ref: (H_out*W_out, tile_n) f32           accumulator scratch
        first = True
        for kh in range(KH):
            for kw in range(KW):
                # Static shifted window of the halo'd block; layout shuffles stay in
                # VMEM/vregs instead of being materialized 9x in HBM.
                a = x_ref[0, kh:kh + H_out, kw:kw + W_out, :]
                a = a.reshape(H_out * W_out, a.shape[-1])
                p = jnp.dot(a, w_ref[kh, kw], preferred_element_type=jnp.float32)
                if first:
                    acc_ref[...] = p
                    first = False
                else:
                    acc_ref[...] += p
        y = acc_ref[...] + b_ref[...]                       # f32 bias add
        o_ref[...] = y.reshape(o_ref.shape).astype(o_ref.dtype)

    return kernel


def conv2d_same_nhwc(x_nhwc, w_hwio, bias=None, *, padding=1,
                     compute_dtype=jnp.bfloat16, tile_n=None):
    """KHxKW / stride-1 / symmetric-padding conv, NHWC activations, fused Pallas kernel.

    x_nhwc: (N, H, W, Cin)    w_hwio: (KH, KW, Cin, Cout)    bias: (Cout,) or None
    Returns (N, H_out, W_out, Cout) in x's dtype.
    """
    N, H, W, Cin = x_nhwc.shape
    KH, KW, Cin_w, Cout = w_hwio.shape
    assert Cin_w == Cin
    H_out = H + 2 * padding - KH + 1
    W_out = W + 2 * padding - KW + 1
    assert H_out > 0 and W_out > 0
    out_dtype = x_nhwc.dtype
    if bias is None:
        bias = jnp.zeros((Cout,), jnp.float32)

    # Channel padding: Cin only to the sublane-pack multiple (not 128); Cout to 128 for
    # lane-dense, unmasked stores.
    cin_mult = 16 if compute_dtype == jnp.bfloat16 else 8
    Cin_p = _round_up(Cin, cin_mult)
    Cout_p = _round_up(Cout, 128)
    if tile_n is None:
        # Keep W resident (single block, constant index) whenever it is modest; only
        # very wide layers get an output-channel grid axis.
        tile_n = Cout_p if Cout_p <= 512 else 256
    assert tile_n % 128 == 0 and Cout_p % tile_n == 0

    # ONE pad pass: spatial halo + channel zero-padding together (no im2col copy, no
    # separate row-padding pass).  Zero-padded Cin columns in both A and W keep the
    # result exact.
    x_pad = jnp.pad(x_nhwc.astype(compute_dtype),
                    ((0, 0), (padding, padding), (padding, padding), (0, Cin_p - Cin)))
    w = jnp.pad(w_hwio.astype(compute_dtype),
                ((0, 0), (0, 0), (0, Cin_p - Cin), (0, Cout_p - Cout)))
    b = jnp.pad(bias.astype(jnp.float32), (0, Cout_p - Cout)).reshape(1, Cout_p)

    Hp, Wp = H + 2 * padding, W + 2 * padding
    grid = (N, Cout_p // tile_n)   # image axis outer, Cout-tile axis inner

    # VMEM budget derived from the actual block sizes (double-buffered I/O + f32 acc),
    # instead of a hard-coded 32 MiB; capped at v7x's 64 MiB per TensorCore.
    csz = jnp.dtype(compute_dtype).itemsize
    osz = jnp.dtype(out_dtype).itemsize
    blk_bytes = (Hp * Wp * Cin_p * csz
                 + KH * KW * Cin_p * tile_n * csz
                 + tile_n * 4
                 + H_out * W_out * tile_n * osz)
    acc_bytes = H_out * W_out * tile_n * 4
    vmem_limit = int(min(64 << 20, max(32 << 20, 2 * blk_bytes + acc_bytes + (8 << 20))))

    flops = 2 * N * H_out * W_out * KH * KW * Cin_p * Cout_p
    bytes_accessed = (N * Hp * Wp * Cin_p * csz
                      + KH * KW * Cin_p * Cout_p * csz
                      + Cout_p * 4
                      + N * H_out * W_out * Cout_p * osz)
    cost = pl.CostEstimate(flops=flops, transcendentals=0,
                           bytes_accessed=bytes_accessed)

    out = pl.pallas_call(
        _make_conv_kernel(H_out, W_out, KH, KW),
        out_shape=jax.ShapeDtypeStruct((N, H_out, W_out, Cout_p), out_dtype),
        grid_spec=pltpu.PrefetchScalarGridSpec(
            num_scalar_prefetch=0,
            grid=grid,
            in_specs=[
                # Padded activation: one full image per step, fetched once per image.
                pl.BlockSpec((1, Hp, Wp, Cin_p), lambda n, j: (n, 0, 0, 0)),
                # Weights: constant block index when Cout fits one tile -> resident.
                pl.BlockSpec((KH, KW, Cin_p, tile_n), lambda n, j: (0, 0, 0, j)),
                # Bias: lane-dense f32 row.
                pl.BlockSpec((1, tile_n), lambda n, j: (0, j)),
            ],
            out_specs=pl.BlockSpec((1, H_out, W_out, tile_n),
                                   lambda n, j: (n, 0, 0, j)),
            scratch_shapes=[pltpu.VMEM((H_out * W_out, tile_n), jnp.float32)],
        ),
        compiler_params=pltpu.CompilerParams(
            dimension_semantics=("parallel", "parallel"),   # megacore / v7x 2 TCs
            vmem_limit_bytes=vmem_limit,
        ),
        cost_estimate=cost,
    )(x_pad, w, b)

    return out[..., :Cout]   # drop lane padding; still NHWC


def split_conv2d_forward_nhwc(x_nhwc, part_weights, part_biases, *,
                              compute_dtype=jnp.bfloat16):
    """SplitConv2d.forward on NHWC activations (preferred, transpose-free path)."""
    w_full = jnp.concatenate(part_weights, axis=0)          # (Cout_total, Cin, KH, KW)
    b_full = jnp.concatenate(part_biases, axis=0)           # (Cout_total,)
    w_hwio = jnp.transpose(w_full, (2, 3, 1, 0))             # (KH, KW, Cin, Cout)
    return conv2d_same_nhwc(x_nhwc, w_hwio, b_full, padding=1,
                            compute_dtype=compute_dtype)


def split_conv2d_forward(x_nchw, part_weights, part_biases, *,
                         compute_dtype=jnp.bfloat16):
    """SplitConv2d.forward: torch.cat([partial_conv(x) for ...], dim=1) on NCHW.

    The two transposes exist only to match the PyTorch NCHW interface; an end-to-end
    NHWC pipeline should call split_conv2d_forward_nhwc directly and skip them.
    """
    x_nhwc = jnp.transpose(x_nchw, (0, 2, 3, 1))
    y = split_conv2d_forward_nhwc(x_nhwc, part_weights, part_biases,
                                  compute_dtype=compute_dtype)
    return jnp.transpose(y, (0, 3, 1, 2))


def _reference_conv(x_nchw, part_weights, part_biases):
    """Pure-JAX reference (lax.conv) for correctness checking."""
    w_full = jnp.concatenate(part_weights, axis=0)
    b_full = jnp.concatenate(part_biases, axis=0)
    y = lax.conv_general_dilated(
        x_nchw, w_full, window_strides=(1, 1), padding=((1, 1), (1, 1)),
        dimension_numbers=("NCHW", "OIHW", "NCHW"))
    return y + b_full[None, :, None, None]


if __name__ == "__main__":
    key = jax.random.PRNGKey(0)

    # Small shapes consistent with the module: batch=2, in_channels=4, 16x16 spatial,
    # original conv with 8 output channels split across num_splits=2 workers.
    N, Cin, H, W = 2, 4, 16, 16
    Cout_total, num_splits = 8, 2
    KH = KW = 3

    kx, kw_key, kb_key = jax.random.split(key, 3)
    x = jax.random.normal(kx, (N, Cin, H, W), dtype=jnp.float32)

    fan_in = Cin * KH * KW
    scale = 1.0 / np.sqrt(fan_in)
    w_full = jax.random.uniform(kw_key, (Cout_total, Cin, KH, KW), jnp.float32,
                                minval=-scale, maxval=scale)
    b_full = jax.random.uniform(kb_key, (Cout_total,), jnp.float32,
                                minval=-scale, maxval=scale)

    # SplitResnet.distribute_channels + PartialConv2d weight slicing.
    parts = distribute_channels(Cout_total, num_splits)
    part_weights, part_biases, begin = [], [], 0
    for c in parts:
        part_weights.append(w_full[begin:begin + c])
        part_biases.append(b_full[begin:begin + c])
        begin += c

    y_ref = jax.block_until_ready(_reference_conv(x, part_weights, part_biases))

    # f32 compute path (exact check against lax.conv reference).
    y_f32 = jax.block_until_ready(
        split_conv2d_forward(x, part_weights, part_biases, compute_dtype=jnp.float32))
    assert y_f32.shape == (N, Cout_total, H, W), y_f32.shape
    np.testing.assert_allclose(np.asarray(y_f32), np.asarray(y_ref),
                               rtol=1e-5, atol=1e-5)

    # Default bf16 streaming path (halved HBM bytes, f32 MXU accumulation).
    y_bf16 = jax.block_until_ready(
        split_conv2d_forward(x, part_weights, part_biases))
    assert y_bf16.shape == (N, Cout_total, H, W), y_bf16.shape
    np.testing.assert_allclose(np.asarray(y_bf16), np.asarray(y_ref),
                               rtol=5e-2, atol=5e-2)

    print("KERNEL_OK")
</pallas_src>

<mosaic_0001>
module attributes {stable_mosaic.version = 11 : i64} {
  func.func @kernel(%arg0: i32, %arg1: i32, %arg2: memref<1x18x18x8xf32, #tpu.memory_space<vmem>>, %arg3: memref<3x3x8x128xf32, #tpu.memory_space<vmem>>, %arg4: memref<1x128xf32, #tpu.memory_space<vmem>>, %arg5: memref<1x16x16x128xf32, #tpu.memory_space<vmem>>, %arg6: memref<256x128xf32, #tpu.memory_space<vmem>>) attributes {dimension_semantics = [#tpu.dimension_semantics<parallel>, #tpu.dimension_semantics<parallel>], iteration_bounds = array<i64: 2, 1>, scalar_prefetch = 0 : i64, scratch_operands = 1 : i64, tpu.core_type = #tpu.core_type<tc>, window_params = [{transform_indices = @transform_0, window_bounds = array<i64: 1, 18, 18, 8>}, {transform_indices = @transform_1, window_bounds = array<i64: 3, 3, 8, 128>}, {transform_indices = @transform_2, window_bounds = array<i64: 1, 128>}, {transform_indices = @transform_3, window_bounds = array<i64: 1, 16, 16, 128>}]} {
    %c0 = arith.constant 0 : index
    %c0_0 = arith.constant 0 : index
    %c0_1 = arith.constant 0 : index
    %c0_2 = arith.constant 0 : index
    %0 = vector.load %arg2[%c0, %c0_0, %c0_1, %c0_2] : memref<1x18x18x8xf32, #tpu.memory_space<vmem>>, vector<1x16x16x8xf32>
    %1 = vector.shape_cast %0 : vector<1x16x16x8xf32> to vector<16x16x8xf32>
    %2 = vector.shape_cast %1 : vector<16x16x8xf32> to vector<256x8xf32>
    %c0_3 = arith.constant 0 : index
    %c0_4 = arith.constant 0 : index
    %c0_5 = arith.constant 0 : index
    %c0_6 = arith.constant 0 : index
    %3 = vector.load %arg3[%c0_3, %c0_4, %c0_5, %c0_6] : memref<3x3x8x128xf32, #tpu.memory_space<vmem>>, vector<1x1x8x128xf32>
    %4 = vector.shape_cast %3 : vector<1x1x8x128xf32> to vector<8x128xf32>
    %cst = arith.constant dense<0.000000e+00> : vector<256x128xf32>
    %5 = tpu.matmul %2, %4, %cst {dimension_numbers = #tpu.dot_dimension_numbers<[1], [0], [0], [1], [0, 0, 1, 1], [], []>} : vector<256x8xf32>, vector<8x128xf32>, vector<256x128xf32> -> vector<256x128xf32>
    %c0_7 = arith.constant 0 : index
    %c0_8 = arith.constant 0 : index
    %6 = vector.load %arg6[%c0_7, %c0_8] : memref<256x128xf32, #tpu.memory_space<vmem>>, vector<256x128xf32>
    tpu.vector_store %arg6[%c0_7, %c0_8], %5 {strides = array<i32>} : memref<256x128xf32, #tpu.memory_space<vmem>>, vector<256x128xf32>,
    %c0_9 = arith.constant 0 : index
    %c0_10 = arith.constant 0 : index
    %c1 = arith.constant 1 : index
    %c0_11 = arith.constant 0 : index
    %7 = vector.load %arg2[%c0_9, %c0_10, %c1, %c0_11] : memref<1x18x18x8xf32, #tpu.memory_space<vmem>>, vector<1x16x16x8xf32>
    %8 = vector.shape_cast %7 : vector<1x16x16x8xf32> to vector<16x16x8xf32>
    %9 = vector.shape_cast %8 : vector<16x16x8xf32> to vector<256x8xf32>
    %c0_12 = arith.constant 0 : index
    %c1_13 = arith.constant 1 : index
    %c0_14 = arith.constant 0 : index
    %c0_15 = arith.constant 0 : index
    %10 = vector.load %arg3[%c0_12, %c1_13, %c0_14, %c0_15] : memref<3x3x8x128xf32, #tpu.memory_space<vmem>>, vector<1x1x8x128xf32>
    %11 = vector.shape_cast %10 : vector<1x1x8x128xf32> to vector<8x128xf32>
    %cst_16 = arith.constant dense<0.000000e+00> : vector<256x128xf32>
    %12 = tpu.matmul %9, %11, %cst_16 {dimension_numbers = #tpu.dot_dimension_numbers<[1], [0], [0], [1], [0, 0, 1, 1], [], []>} : vector<256x8xf32>, vector<8x128xf32>, vector<256x128xf32> -> vector<256x128xf32>
    %c0_17 = arith.constant 0 : index
    %c0_18 = arith.constant 0 : index
    %13 = vector.load %arg6[%c0_17, %c0_18] : memref<256x128xf32, #tpu.memory_space<vmem>>, vector<256x128xf32>
    %14 = arith.addf %13, %12 : vector<256x128xf32>
    %c0_19 = arith.constant 0 : index
    %c0_20 = arith.constant 0 : index
    %15 = vector.load %arg6[%c0_19, %c0_20] : memref<256x128xf32, #tpu.memory_space<vmem>>, vector<256x128xf32>
    tpu.vector_store %arg6[%c0_19, %c0_20], %14 {strides = array<i32>} : memref<256x128xf32, #tpu.memory_space<vmem>>, vector<256x128xf32>,
    %c0_21 = arith.constant 0 : index
    %c0_22 = arith.constant 0 : index
    %c2 = arith.constant 2 : index
    %c0_23 = arith.constant 0 : index
    %16 = vector.load %arg2[%c0_21, %c0_22, %c2, %c0_23] : memref<1x18x18x8xf32, #tpu.memory_space<vmem>>, vector<1x16x16x8xf32>
    %17 = vector.shape_cast %16 : vector<1x16x16x8xf32> to vector<16x16x8xf32>
    %18 = vector.shape_cast %17 : vector<16x16x8xf32> to vector<256x8xf32>
    %c0_24 = arith.constant 0 : index
    %c2_25 = arith.constant 2 : index
    %c0_26 = arith.constant 0 : index
    %c0_27 = arith.constant 0 : index
    %19 = vector.load %arg3[%c0_24, %c2_25, %c0_26, %c0_27] : memref<3x3x8x128xf32, #tpu.memory_space<vmem>>, vector<1x1x8x128xf32>
    %20 = vector.shape_cast %19 : vector<1x1x8x128xf32> to vector<8x128xf32>
    %cst_28 = arith.constant dense<0.000000e+00> : vector<256x128xf32>
    %21 = tpu.matmul %18, %20, %cst_28 {dimension_numbers = #tpu.dot_dimension_numbers<[1], [0], [0], [1], [0, 0, 1, 1], [], []>} : vector<256x8xf32>, vector<8x128xf32>, vector<256x128xf32> -> vector<256x128xf32>
    %c0_29 = arith.constant 0 : index
    %c0_30 = arith.constant 0 : index
    %22 = vector.load %arg6[%c0_29, %c0_30] : memref<256x128xf32, #tpu.memory_space<vmem>>, vector<256x128xf32>
    %23 = arith.addf %22, %21 : vector<256x128xf32>
    %c0_31 = arith.constant 0 : index
    %c0_32 = arith.constant 0 : index
    %24 = vector.load %arg6[%c0_31, %c0_32] : memref<256x128xf32, #tpu.memory_space<vmem>>, vector<256x128xf32>
    tpu.vector_store %arg6[%c0_31, %c0_32], %23 {strides = array<i32>} : memref<256x128xf32, #tpu.memory_space<vmem>>, vector<256x128xf32>,
    %c0_33 = arith.constant 0 : index
    %c1_34 = arith.constant 1 : index
    %c0_35 = arith.constant 0 : index
    %c0_36 = arith.constant 0 : index
    %25 = vector.load %arg2[%c0_33, %c1_34, %c0_35, %c0_36] : memref<1x18x18x8xf32, #tpu.memory_space<vmem>>, vector<1x16x16x8xf32>
    %26 = vector.shape_cast %25 : vector<1x16x16x8xf32> to vector<16x16x8xf32>
    %27 = vector.shape_cast %26 : vector<16x16x8xf32> to vector<256x8xf32>
    %c1_37 = arith.constant 1 : index
    %c0_38 = arith.constant 0 : index
    %c0_39 = arith.constant 0 : index
    %c0_40 = arith.constant 0 : index
    %28 = vector.load %arg3[%c1_37, %c0_38, %c0_39, %c0_40] : memref<3x3x8x128xf32, #tpu.memory_space<vmem>>, vector<1x1x8x128xf32>
    %29 = vector.shape_cast %28 : vector<1x1x8x128xf32> to vector<8x128xf32>
    %cst_41 = arith.constant dense<0.000000e+00> : vector<256x128xf32>
    %30 = tpu.matmul %27, %29, %cst_41 {dimension_numbers = #tpu.dot_dimension_numbers<[1], [0], [0], [1], [0, 0, 1, 1], [], []>} : vector<256x8xf32>, vector<8x128xf32>, vector<256x128xf32> -> vector<256x128xf32>
    %c0_42 = arith.constant 0 : index
    %c0_43 = arith.constant 0 : index
    %31 = vector.load %arg6[%c0_42, %c0_43] : memref<256x128xf32, #tpu.memory_space<vmem>>, vector<256x128xf32>
    %32 = arith.addf %31, %30 : vector<256x128xf32>
    %c0_44 = arith.constant 0 : index
    %c0_45 = arith.constant 0 : index
    %33 = vector.load %arg6[%c0_44, %c0_45] : memref<256x128xf32, #tpu.memory_space<vmem>>, vector<256x128xf32>
    tpu.vector_store %arg6[%c0_44, %c0_45], %32 {strides = array<i32>} : memref<256x128xf32, #tpu.memory_space<vmem>>, vector<256x128xf32>,
    %c0_46 = arith.constant 0 : index
    %c1_47 = arith.constant 1 : index
    %c1_48 = arith.constant 1 : index
    %c0_49 = arith.constant 0 : index
    %34 = vector.load %arg2[%c0_46, %c1_47, %c1_48, %c0_49] : memref<1x18x18x8xf32, #tpu.memory_space<vmem>>, vector<1x16x16x8xf32>
    %35 = vector.shape_cast %34 : vector<1x16x16x8xf32> to vector<16x16x8xf32>
    %36 = vector.shape_cast %35 : vector<16x16x8xf32> to vector<256x8xf32>
    %c1_50 = arith.constant 1 : index
    %c1_51 = arith.constant 1 : index
    %c0_52 = arith.constant 0 : index
    %c0_53 = arith.constant 0 : index
    %37 = vector.load %arg3[%c1_50, %c1_51, %c0_52, %c0_53] : memref<3x3x8x128xf32, #tpu.memory_space<vmem>>, vector<1x1x8x128xf32>
    %38 = vector.shape_cast %37 : vector<1x1x8x128xf32> to vector<8x128xf32>
    %cst_54 = arith.constant dense<0.000000e+00> : vector<256x128xf32>
    %39 = tpu.matmul %36, %38, %cst_54 {dimension_numbers = #tpu.dot_dimension_numbers<[1], [0], [0], [1], [0, 0, 1, 1], [], []>} : vector<256x8xf32>, vector<8x128xf32>, vector<256x128xf32> -> vector<256x128xf32>
    %c0_55 = arith.constant 0 : index
    %c0_56 = arith.constant 0 : index
    %40 = vector.load %arg6[%c0_55, %c0_56] : memref<256x128xf32, #tpu.memory_space<vmem>>, vector<256x128xf32>
    %41 = arith.addf %40, %39 : vector<256x128xf32>
    %c0_57 = arith.constant 0 : index
    %c0_58 = arith.constant 0 : index
    %42 = vector.load %arg6[%c0_57, %c0_58] : memref<256x128xf32, #tpu.memory_space<vmem>>, vector<256x128xf32>
    tpu.vector_store %arg6[%c0_57, %c0_58], %41 {strides = array<i32>} : memref<256x128xf32, #tpu.memory_space<vmem>>, vector<256x128xf32>,
    %c0_59 = arith.constant 0 : index
    %c1_60 = arith.constant 1 : index
    %c2_61 = arith.constant 2 : index
    %c0_62 = arith.constant 0 : index
    %43 = vector.load %arg2[%c0_59, %c1_60, %c2_61, %c0_62] : memref<1x18x18x8xf32, #tpu.memory_space<vmem>>, vector<1x16x16x8xf32>
    %44 = vector.shape_cast %43 : vector<1x16x16x8xf32> to vector<16x16x8xf32>
    %45 = vector.shape_cast %44 : vector<16x16x8xf32> to vector<256x8xf32>
    %c1_63 = arith.constant 1 : index
    %c2_64 = arith.constant 2 : index
    %c0_65 = arith.constant 0 : index
    %c0_66 = arith.constant 0 : index
    %46 = vector.load %arg3[%c1_63, %c2_64, %c0_65, %c0_66] : memref<3x3x8x128xf32, #tpu.memory_space<vmem>>, vector<1x1x8x128xf32>
    %47 = vector.shape_cast %46 : vector<1x1x8x128xf32> to vector<8x128xf32>
    %cst_67 = arith.constant dense<0.000000e+00> : vector<256x128xf32>
    %48 = tpu.matmul %45, %47, %cst_67 {dimension_numbers = #tpu.dot_dimension_numbers<[1], [0], [0], [1], [0, 0, 1, 1], [], []>} : vector<256x8xf32>, vector<8x128xf32>, vector<256x128xf32> -> vector<256x128xf32>
    %c0_68 = arith.constant 0 : index
    %c0_69 = arith.constant 0 : index
    %49 = vector.load %arg6[%c0_68, %c0_69] : memref<256x128xf32, #tpu.memory_space<vmem>>, vector<256x128xf32>
    %50 = arith.addf %49, %48 : vector<256x128xf32>
    %c0_70 = arith.constant 0 : index
    %c0_71 = arith.constant 0 : index
    %51 = vector.load %arg6[%c0_70, %c0_71] : memref<256x128xf32, #tpu.memory_space<vmem>>, vector<256x128xf32>
    tpu.vector_store %arg6[%c0_70, %c0_71], %50 {strides = array<i32>} : memref<256x128xf32, #tpu.memory_space<vmem>>, vector<256x128xf32>,
    %c0_72 = arith.constant 0 : index
    %c2_73 = arith.constant 2 : index
    %c0_74 = arith.constant 0 : index
    %c0_75 = arith.constant 0 : index
    %52 = vector.load %arg2[%c0_72, %c2_73, %c0_74, %c0_75] : memref<1x18x18x8xf32, #tpu.memory_space<vmem>>, vector<1x16x16x8xf32>
    %53 = vector.shape_cast %52 : vector<1x16x16x8xf32> to vector<16x16x8xf32>
    %54 = vector.shape_cast %53 : vector<16x16x8xf32> to vector<256x8xf32>
    %c2_76 = arith.constant 2 : index
    %c0_77 = arith.constant 0 : index
    %c0_78 = arith.constant 0 : index
    %c0_79 = arith.constant 0 : index
    %55 = vector.load %arg3[%c2_76, %c0_77, %c0_78, %c0_79] : memref<3x3x8x128xf32, #tpu.memory_space<vmem>>, vector<1x1x8x128xf32>
    %56 = vector.shape_cast %55 : vector<1x1x8x128xf32> to vector<8x128xf32>
    %cst_80 = arith.constant dense<0.000000e+00> : vector<256x128xf32>
    %57 = tpu.matmul %54, %56, %cst_80 {dimension_numbers = #tpu.dot_dimension_numbers<[1], [0], [0], [1], [0, 0, 1, 1], [], []>} : vector<256x8xf32>, vector<8x128xf32>, vector<256x128xf32> -> vector<256x128xf32>
    %c0_81 = arith.constant 0 : index
    %c0_82 = arith.constant 0 : index
    %58 = vector.load %arg6[%c0_81, %c0_82] : memref<256x128xf32, #tpu.memory_space<vmem>>, vector<256x128xf32>
    %59 = arith.addf %58, %57 : vector<256x128xf32>
    %c0_83 = arith.constant 0 : index
    %c0_84 = arith.constant 0 : index
    %60 = vector.load %arg6[%c0_83, %c0_84] : memref<256x128xf32, #tpu.memory_space<vmem>>, vector<256x128xf32>
    tpu.vector_store %arg6[%c0_83, %c0_84], %59 {strides = array<i32>} : memref<256x128xf32, #tpu.memory_space<vmem>>, vector<256x128xf32>,
    %c0_85 = arith.constant 0 : index
    %c2_86 = arith.constant 2 : index
    %c1_87 = arith.constant 1 : index
    %c0_88 = arith.constant 0 : index
    %61 = vector.load %arg2[%c0_85, %c2_86, %c1_87, %c0_88] : memref<1x18x18x8xf32, #tpu.memory_space<vmem>>, vector<1x16x16x8xf32>
    %62 = vector.shape_cast %61 : vector<1x16x16x8xf32> to vector<16x16x8xf32>
    %63 = vector.shape_cast %62 : vector<16x16x8xf32> to vector<256x8xf32>
    %c2_89 = arith.constant 2 : index
    %c1_90 = arith.constant 1 : index
    %c0_91 = arith.constant 0 : index
    %c0_92 = arith.constant 0 : index
    %64 = vector.load %arg3[%c2_89, %c1_90, %c0_91, %c0_92] : memref<3x3x8x128xf32, #tpu.memory_space<vmem>>, vector<1x1x8x128xf32>
    %65 = vector.shape_cast %64 : vector<1x1x8x128xf32> to vector<8x128xf32>
    %cst_93 = arith.constant dense<0.000000e+00> : vector<256x128xf32>
    %66 = tpu.matmul %63, %65, %cst_93 {dimension_numbers = #tpu.dot_dimension_numbers<[1], [0], [0], [1], [0, 0, 1, 1], [], []>} : vector<256x8xf32>, vector<8x128xf32>, vector<256x128xf32> -> vector<256x128xf32>
    %c0_94 = arith.constant 0 : index
    %c0_95 = arith.constant 0 : index
    %67 = vector.load %arg6[%c0_94, %c0_95] : memref<256x128xf32, #tpu.memory_space<vmem>>, vector<256x128xf32>
    %68 = arith.addf %67, %66 : vector<256x128xf32>
    %c0_96 = arith.constant 0 : index
    %c0_97 = arith.constant 0 : index
    %69 = vector.load %arg6[%c0_96, %c0_97] : memref<256x128xf32, #tpu.memory_space<vmem>>, vector<256x128xf32>
    tpu.vector_store %arg6[%c0_96, %c0_97], %68 {strides = array<i32>} : memref<256x128xf32, #tpu.memory_space<vmem>>, vector<256x128xf32>,
    %c0_98 = arith.constant 0 : index
    %c2_99 = arith.constant 2 : index
    %c2_100 = arith.constant 2 : index
    %c0_101 = arith.constant 0 : index
    %70 = vector.load %arg2[%c0_98, %c2_99, %c2_100, %c0_101] : memref<1x18x18x8xf32, #tpu.memory_space<vmem>>, vector<1x16x16x8xf32>
    %71 = vector.shape_cast %70 : vector<1x16x16x8xf32> to vector<16x16x8xf32>
    %72 = vector.shape_cast %71 : vector<16x16x8xf32> to vector<256x8xf32>
    %c2_102 = arith.constant 2 : index
    %c2_103 = arith.constant 2 : index
    %c0_104 = arith.constant 0 : index
    %c0_105 = arith.constant 0 : index
    %73 = vector.load %arg3[%c2_102, %c2_103, %c0_104, %c0_105] : memref<3x3x8x128xf32, #tpu.memory_space<vmem>>, vector<1x1x8x128xf32>
    %74 = vector.shape_cast %73 : vector<1x1x8x128xf32> to vector<8x128xf32>
    %cst_106 = arith.constant dense<0.000000e+00> : vector<256x128xf32>
    %75 = tpu.matmul %72, %74, %cst_106 {dimension_numbers = #tpu.dot_dimension_numbers<[1], [0], [0], [1], [0, 0, 1, 1], [], []>} : vector<256x8xf32>, vector<8x128xf32>, vector<256x128xf32> -> vector<256x128xf32>
    %c0_107 = arith.constant 0 : index
    %c0_108 = arith.constant 0 : index
    %76 = vector.load %arg6[%c0_107, %c0_108] : memref<256x128xf32, #tpu.memory_space<vmem>>, vector<256x128xf32>
    %77 = arith.addf %76, %75 : vector<256x128xf32>
    %c0_109 = arith.constant 0 : index
    %c0_110 = arith.constant 0 : index
    %78 = vector.load %arg6[%c0_109, %c0_110] : memref<256x128xf32, #tpu.memory_space<vmem>>, vector<256x128xf32>
    tpu.vector_store %arg6[%c0_109, %c0_110], %77 {strides = array<i32>} : memref<256x128xf32, #tpu.memory_space<vmem>>, vector<256x128xf32>,
    %c0_111 = arith.constant 0 : index
    %c0_112 = arith.constant 0 : index
    %79 = vector.load %arg6[%c0_111, %c0_112] : memref<256x128xf32, #tpu.memory_space<vmem>>, vector<256x128xf32>
    %c0_113 = arith.constant 0 : index
    %c0_114 = arith.constant 0 : index
    %80 = vector.load %arg4[%c0_113, %c0_114] : memref<1x128xf32, #tpu.memory_space<vmem>>, vector<1x128xf32>
    %81 = vector.broadcast %80 : vector<1x128xf32> to vector<256x128xf32>
    %82 = arith.addf %79, %81 : vector<256x128xf32>
    %83 = vector.shape_cast %82 : vector<256x128xf32> to vector<1x16x16x128xf32>
    %c0_115 = arith.constant 0 : index
    %c0_116 = arith.constant 0 : index
    %c0_117 = arith.constant 0 : index
    %c0_118 = arith.constant 0 : index
    %84 = vector.load %arg5[%c0_115, %c0_116, %c0_117, %c0_118] : memref<1x16x16x128xf32, #tpu.memory_space<vmem>>, vector<1x16x16x128xf32>
    tpu.vector_store %arg5[%c0_115, %c0_116, %c0_117, %c0_118], %83 {strides = array<i32>} : memref<1x16x16x128xf32, #tpu.memory_space<vmem>>, vector<1x16x16x128xf32>,
    return
  }
  func.func @transform_0(%arg0: i32, %arg1: i32) -> (i32, i32, i32, i32) {
    %c0_i32 = arith.constant 0 : i32
    %c0_i32_0 = arith.constant 0 : i32
    %c0_i32_1 = arith.constant 0 : i32
    %c0_i32_2 = arith.constant 0 : i32
    return %arg0, %c0_i32, %c0_i32_0, %c0_i32_1 : i32, i32, i32, i32
  }
  func.func @transform_1(%arg0: i32, %arg1: i32) -> (i32, i32, i32, i32) {
    %c0_i32 = arith.constant 0 : i32
    %c0_i32_0 = arith.constant 0 : i32
    %c0_i32_1 = arith.constant 0 : i32
    %c0_i32_2 = arith.constant 0 : i32
    return %c0_i32, %c0_i32_0, %c0_i32_1, %arg1 : i32, i32, i32, i32
  }
  func.func @transform_2(%arg0: i32, %arg1: i32) -> (i32, i32) {
    %c0_i32 = arith.constant 0 : i32
    %c0_i32_0 = arith.constant 0 : i32
    return %c0_i32, %arg1 : i32, i32
  }
  func.func @transform_3(%arg0: i32, %arg1: i32) -> (i32, i32, i32, i32) {
    %c0_i32 = arith.constant 0 : i32
    %c0_i32_0 = arith.constant 0 : i32
    %c0_i32_1 = arith.constant 0 : i32
    return %arg0, %c0_i32, %c0_i32_0, %arg1 : i32, i32, i32, i32
  }
}

</mosaic_0001>

<bundles_post_ra>
// kernel: tpu_custom_call.1
= control target key start
LH: loop header
LB: loop body
LE: loop exit
PB: predicated region body
PF: predicated region fallthrough
CT: control target
= control target key end

     0   :  { %8 = vsyncpa [#allocation4], 0  ;;  %s7421_s0 = inlined_call_operand.vmem [shape: f32[2,18,18,8], index: 0, kind: input, shape index: {}]   ;;  %s7422_s1 = inlined_call_operand.vmem [shape: f32[3,3,8,128], index: 1, kind: input, shape index: {}]   ;;  %s7423_s2 = inlined_call_operand.vmem [shape: f32[1,128], index: 2, kind: input, shape index: {}]   ;;  %s7424_s3 = inlined_call_operand.hbm [shape: f32[2,16,16,128], index: 3, kind: output, shape index: {}]  }
   0x1   :  { %10 = vsyncpa [#allocation4 + $0x1], 0  ;;  %s5840_s12 = smov 0   ;;  %s5842_s13 = smov 0  }
   0x2   :  { %s5844_s14 = smov 0   ;;  %s5846_s15 = smov 0  }
   0x3   :  { %s5848_s16 = smov 0   ;;  %s5850_s17 = smov 0  }
   0x4 LB: > { %s4428_s18 = sadd.s32 4294967295, %s5815_s17   ;;  %s4429_s19 = sadd.s32 4294967294, %s5815_s17   ;;  %s5815_s17 = sphi %s5850_s17, %s16_s17   ;;  %s5811_s16 = sphi %s5848_s16, %s7698_s16   ;;  %s5807_s15 = sphi %s5846_s15, %s7697_s15   ;;  %s5803_s14 = sphi %s5844_s14, %s7696_s14   ;;  %s5799_s13 = sphi %s5842_s13, %s7695_s13   ;;  %s5795_s12 = sphi %s5840_s12, %s7694_s12  }
   0x5   : > { %s28_s20 = sadd.s32 1, %s5811_s16  ;;  %s115_s21 = sadd.s32 1, %s5803_s14 }
   0x6   : > { %p30_p0 = scmp.ge.s32.totalorder %s28_s20, 2  ;;  %p125_p1 = scmp.ne.s32.totalorder %s5803_s14, %s5799_s13 }
   0x7   : > { %p126_p2 = scmp.eq.s32.totalorder %s4428_s18, 1  ;;  %p131_p3 = scmp.ne.s32.totalorder %s5799_s13, %s5795_s12 }
   0x8   : > { %s7700_s20 = smov (%p30_p0, %s28_s20), 0  ;;  %p132_p5 = scmp.eq.s32.totalorder %s4429_s19, 1 }
   0x9   : > { %p5880_p4 = por %p126_p2, %p125_p1  ;;  %s110_s23 = ssub.s32 %s5811_s16, %s7700_s20 }
   0xa   : > { %p4434_p6 = scmp.ge.s32.totalorder %s5815_s17, 1  ;;  %p113_p7 = scmp.eq.s32.totalorder %s110_s23, 0 }
   0xb   : > { %p5887_p8 = por %p132_p5, %p131_p3  ;;  %p171_p9 = scmp.lt.s32.totalorder %s5815_s17, 3 }
   0xc   : > { %s5893_s25 = scalar_select %p113_p7, %s5803_s14, %s115_s21  }
   0xd   : > { %p172_p10 = pnand %p4434_p6, %p171_p9 }
   0xf   : > { %175 = sbr.rel (%p172_p10) target bundleno = 529 (0x211), region = 32 }
  0x14   : > { %v246_v0 = vld [vmem:[%s7422_s1] sm:$0xff]  ;;  %p202_p11 = scmp.lt.s32.totalorder %s5807_s15, 1  ;;  %v4469_v1 = vld [vmem:[%s7422_s1 + $0x8] sm:$0xff]  ;;  %v4502_v2 = vld [vmem:[%s7422_s1 + $0x10] sm:$0xff]  ;;  %vm247_vm0 = vcmask 64512   ;;  %s4931_s10 = sshll.u32 %s5807_s15, 12 }
  0x15   : > { %5679 = vmatprep.subr.mxu1 %v246_v0  ;;  %5229 = vmatprep.subr.mxu0 %v246_v0  ;;  %v5934_v9 = vld [vmem:[%s7422_s1 + $0x18] sm:$0xff]  ;;  %v5939_v10 = vld [vmem:[%s7422_s1 + $0x20] sm:$0xff]  ;;  %v6094_v43 = vld [vmem:[%s7422_s1 + $0x28] sm:$0xff]  ;;  %s7367_s21 = scalar_lea.hbm %s7424_s3, %s4931_s10  ;;  %s5817_s26 = smov [#allocation3]  }
  0x16   : > { %5680 = vmatpush3.msra.mxu1 %v246_v0  ;;  %5230 = vmatpush3.msra.mxu0 %v246_v0  ;;  %s203_s5 = scalar_select %p202_p11, %s5807_s15, 1  ;;  %v6099_v44 = vld [vmem:[%s7422_s1 + $0x30] sm:$0xff] }
  0x17   : > { %5279 = vmatprep.subr.mxu1 %v4469_v1  ;;  %5329 = vmatprep.subr.mxu0 %v4502_v2  ;;  %s5743_s27 = sshll.u32 %s5817_s26, 4  ;;  %s5744_s27 = int_to_ptr.vmem [resolvable:$false] %s5743_s27 }
  0x18   : > { %s5681_s6 = smul.u32 432, %s203_s5  ;;  %s199_s5 = sand.u32 1, %s5799_s13  }
  0x19   : > { %s7376_s15 = scalar_lea.sflag [#allocation4], %s199_s5  ;;  %s5745_s28 = scalar_lea.vmem %s5744_s27, 8192 }
  0x1a   : > { %s5909_s9 = scalar_lea.vmem %s7421_s0, %s5681_s6  ;;  %s4435_s6 = sshll.u32 %s199_s5, 8 }
  0x1b   : > { %v214_v3 = vld [vmem:[%s5909_s9] sm:$0xff]  ;;  %v215_v5 = vld [vmem:[%s5909_s9 + $0x8] sm:$0xff]  ;;  %v5923_v7 = vld [vmem:[%s5909_s9 + $0x18] sm:$0xff] }
  0x1c   : > { %v5913_v4 = vld [vmem:[%s5909_s9 + $0xc0] sm:$0xff]  ;;  %5231 = vmatprep.mubr.msk.f32.mxu0 %vm247_vm0, %v214_v3  ;;  %v5920_v6 = vld [vmem:[%s5909_s9 + $0xc8] sm:$0xff]  ;;  %v5926_v8 = vld [vmem:[%s5909_s9 + $0xd8] sm:$0xff] }
  0x1d   : > { %5255 = vmatprep.mubr.msk.f32.mxu1 %vm247_vm0, %v5913_v4  ;;  %5232 = vmatmul.mubr.msk.f32.vlgmr.msra.gmra.mxu0 %vm247_vm0, %v215_v5  ;;  %v5942_v11 = vld [vmem:[%s5909_s9 + $0x20] sm:$0xff]  ;;  %v5952_v13 = vld [vmem:[%s5909_s9 + $0x30] sm:$0xff]  ;;  %v5968_v15 = vld [vmem:[%s5909_s9 + $0x38] sm:$0xff] }
  0x1e   : > { %5256 = vmatmul.mubr.msk.f32.vlgmr.msra.gmra.mxu1 %vm247_vm0, %v5920_v6  ;;  %5330 = vmatpush3.msra.mxu0 %v4502_v2  ;;  %v5945_v12 = vld [vmem:[%s5909_s9 + $0xe0] sm:$0xff]  ;;  %v5955_v14 = vld [vmem:[%s5909_s9 + $0xf0] sm:$0xff]  ;;  %v5971_v16 = vld [vmem:[%s5909_s9 + $0xf8] sm:$0xff] }
  0x1f   : > { %5280 = vmatpush3.msra.mxu1 %v4469_v1  ;;  %5234 = vmatprep.mubr.msk.f32.mxu0 %vm247_vm0, %v5923_v7  ;;  %v5974_v17 = vld [vmem:[%s5909_s9 + $0x48] sm:$0xff]  ;;  %v5988_v19 = vld [vmem:[%s5909_s9 + $0x50] sm:$0xff]  ;;  %v5994_v21 = vld [vmem:[%s5909_s9 + $0x60] sm:$0xff] }
  0x20   : > { %5258 = vmatprep.mubr.msk.f32.mxu1 %vm247_vm0, %v5926_v8  ;;  %5379 = vmatprep.subr.mxu1 %v5934_v9  ;;  %v5977_v18 = vld [vmem:[%s5909_s9 + $0x108] sm:$0xff]  ;;  %v5991_v20 = vld [vmem:[%s5909_s9 + $0x110] sm:$0xff]  ;;  %v5997_v22 = vld [vmem:[%s5909_s9 + $0x120] sm:$0xff] }
  0x21   : > { %5429 = vmatprep.subr.mxu0 %v5939_v10  ;;  %5235 = vmatmul.mubr.msk.f32.gmra.mxu0 %vm247_vm0, %v5942_v11  ;;  %v6008_v23 = vld [vmem:[%s5909_s9 + $0x68] sm:$0xff]  ;;  %v6014_v25 = vld [vmem:[%s5909_s9 + $0x78] sm:$0xff]  ;;  %v6028_v27 = vld [vmem:[%s5909_s9 + $0x80] sm:$0xff] }
  0x22   : > { %5259 = vmatmul.mubr.msk.f32.gmra.mxu1 %vm247_vm0, %v5945_v12  ;;  %5237 = vmatprep.mubr.msk.f32.mxu0 %vm247_vm0, %v5952_v13  ;;  %v6011_v24 = vld [vmem:[%s5909_s9 + $0x128] sm:$0xff]  ;;  %v6017_v26 = vld [vmem:[%s5909_s9 + $0x138] sm:$0xff]  ;;  %v6031_v28 = vld [vmem:[%s5909_s9 + $0x140] sm:$0xff] }
  0x23   : > { %5261 = vmatprep.mubr.msk.f32.mxu1 %vm247_vm0, %v5955_v14  ;;  %v6034_v29 = vld [vmem:[%s5909_s9 + $0x90] sm:$0xff]  ;;  %v6048_v31 = vld [vmem:[%s5909_s9 + $0x98] sm:$0xff]  ;;  %v6054_v33 = vld [vmem:[%s5909_s9 + $0xa8] sm:$0xff] }
  0x24   : > { %v6037_v30 = vld [vmem:[%s5909_s9 + $0x150] sm:$0xff]  ;;  %v6051_v32 = vld [vmem:[%s5909_s9 + $0x158] sm:$0xff]  ;;  %v6057_v34 = vld [vmem:[%s5909_s9 + $0x168] sm:$0xff] }
  0x25   : > { %5238 = vmatmul.mubr.msk.f32.gmra.mxu0 %vm247_vm0, %v5968_v15  ;;  %v6068_v35 = vld [vmem:[%s5909_s9 + $0xb0] sm:$0xff]  ;;  %v601_v37 = vld [vmem:[%s5909_s9 + $0x1] sm:$0xff]  ;;  %v6084_v41 = vld [vmem:[%s5909_s9 + $0x19] sm:$0xff] }
  0x26   : > { %5262 = vmatmul.mubr.msk.f32.gmra.mxu1 %vm247_vm0, %v5971_v16  ;;  %5240 = vmatprep.mubr.msk.f32.mxu0 %vm247_vm0, %v5974_v17  ;;  %v6071_v36 = vld [vmem:[%s5909_s9 + $0x170] sm:$0xff]  ;;  %v1052_v38 = vld [vmem:[%s5909_s9 + $0x2] sm:$0xff]  ;;  %v6087_v42 = vld [vmem:[%s5909_s9 + $0x1a] sm:$0xff] }
  0x27   : > { %5264 = vmatprep.mubr.msk.f32.mxu1 %vm247_vm0, %v5977_v18  ;;  %7494 = vst [vmem:[#allocation6_spill] sm:$0xff] %v6071_v36  ;;  %v602_v39 = vld [vmem:[%s5909_s9 + $0x9] sm:$0xff]  ;;  %7495 = vst [vmem:[#allocation7_spill] sm:$0xff] %v6087_v42  ;;  %v6104_v45 = vld [vmem:[%s5909_s9 + $0x21] sm:$0xff] }
  0x28   : > { %v1053_v40 = vld [vmem:[%s5909_s9 + $0xa] sm:$0xff]  ;;  %v6107_v46 = vld [vmem:[%s5909_s9 + $0x22] sm:$0xff]  ;;  %v6117_v48 = vld [vmem:[%s5909_s9 + $0x32] sm:$0xff] }
  0x29   : > { %5241 = vmatmul.mubr.msk.f32.gmra.mxu0 %vm247_vm0, %v5988_v19  ;;  %7496 = vst [vmem:[#allocation8_spill] sm:$0xff] %v6107_v46  ;;  %v6114_v47 = vld [vmem:[%s5909_s9 + $0x31] sm:$0xff]  ;;  %7497 = vst [vmem:[#allocation9_spill] sm:$0xff] %v6117_v48  ;;  %v6130_v49 = vld [vmem:[%s5909_s9 + $0x39] sm:$0xff] }
  0x2a   : > { %5265 = vmatmul.mubr.msk.f32.gmra.mxu1 %vm247_vm0, %v5991_v20  ;;  %5243 = vmatprep.mubr.msk.f32.mxu0 %vm247_vm0, %v5994_v21  ;;  %v6133_v50 = vld [vmem:[%s5909_s9 + $0x3a] sm:$0xff]  ;;  %v6136_v51 = vld [vmem:[%s5909_s9 + $0x49] sm:$0xff]  ;;  %v6150_v53 = vld [vmem:[%s5909_s9 + $0x51] sm:$0xff] }
  0x2b   : > { %5267 = vmatprep.mubr.msk.f32.mxu1 %vm247_vm0, %v5997_v22  ;;  %7498 = vst [vmem:[#allocation10_spill] sm:$0xff] %v6133_v50  ;;  %v6139_v52 = vld [vmem:[%s5909_s9 + $0x4a] sm:$0xff]  ;;  %v6153_v54 = vld [vmem:[%s5909_s9 + $0x52] sm:$0xff]  ;;  %v6156_v55 = vld [vmem:[%s5909_s9 + $0x61] sm:$0xff] }
  0x2c   : > { %7499 = vst [vmem:[#allocation11_spill] sm:$0xff] %v6139_v52  ;;  %7500 = vst [vmem:[#allocation12_spill] sm:$0xff] %v6153_v54  ;;  %v6159_v56 = vld [vmem:[%s5909_s9 + $0x62] sm:$0xff]  ;;  %v6173_v58 = vld [vmem:[%s5909_s9 + $0x6a] sm:$0xff] }
  0x2d   : > { %5244 = vmatmul.mubr.msk.f32.gmra.mxu0 %vm247_vm0, %v6008_v23  ;;  %7501 = vst [vmem:[#allocation13_spill] sm:$0xff] %v6159_v56  ;;  %v6170_v57 = vld [vmem:[%s5909_s9 + $0x69] sm:$0xff]  ;;  %7502 = vst [vmem:[#allocation14_spill] sm:$0xff] %v6173_v58  ;;  %v6176_v59 = vld [vmem:[%s5909_s9 + $0x79] sm:$0xff] }
  0x2e   : > { %5268 = vmatmul.mubr.msk.f32.gmra.mxu1 %vm247_vm0, %v6011_v24  ;;  %5246 = vmatprep.mubr.msk.f32.mxu0 %vm247_vm0, %v6014_v25  ;;  %v6179_v60 = vld [vmem:[%s5909_s9 + $0x7a] sm:$0xff]  ;;  %v6193_v62 = vld [vmem:[%s5909_s9 + $0x82] sm:$0xff]  ;;  %v6196_v63 = vld [vmem:[%s5909_s9 + $0x91] sm:$0xff] }
  0x2f   : > { %5270 = vmatprep.mubr.msk.f32.mxu1 %vm247_vm0, %v6017_v26  ;;  %7503 = vst [vmem:[#allocation15_spill] sm:$0xff] %v6179_v60  ;;  %v6190_v61 = vld [vmem:[%s5909_s9 + $0x81] sm:$0xff]  ;;  %7504 = vst [vmem:[#allocation16_spill] sm:$0xff] %v6193_v62  ;;  %v6199_v0 = vld [vmem:[%s5909_s9 + $0x92] sm:$0xff] }
  0x30   : > { %7505 = vst [vmem:[#allocation17_spill] sm:$0xff] %v6199_v0  ;;  %v6210_v1 = vld [vmem:[%s5909_s9 + $0x99] sm:$0xff]  ;;  %v6216_v3 = vld [vmem:[%s5909_s9 + $0xa9] sm:$0xff] }
  0x31   : > { %5247 = vmatmul.mubr.msk.f32.gmra.mxu0 %vm247_vm0, %v6028_v27  ;;  %v6213_v2 = vld [vmem:[%s5909_s9 + $0x9a] sm:$0xff]  ;;  %v6219_v5 = vld [vmem:[%s5909_s9 + $0xaa] sm:$0xff] }
  0x32   : > { %5271 = vmatmul.mubr.msk.f32.gmra.mxu1 %vm247_vm0, %v6031_v28  ;;  %5249 = vmatprep.mubr.msk.f32.mxu0 %vm247_vm0, %v6034_v29  ;;  %7506 = vst [vmem:[#allocation18_spill] sm:$0xff] %v6213_v2  ;;  %7507 = vst [vmem:[#allocation19_spill] sm:$0xff] %v6219_v5 }
  0x33   : > { %5273 = vmatprep.mubr.msk.f32.mxu1 %vm247_vm0, %v6037_v30 }
  0x35   : > { %5250 = vmatmul.mubr.msk.f32.gmra.mxu0 %vm247_vm0, %v6048_v31 }
  0x36   : > { %5274 = vmatmul.mubr.msk.f32.gmra.mxu1 %vm247_vm0, %v6051_v32  ;;  %5252 = vmatprep.mubr.msk.f32.mxu0 %vm247_vm0, %v6054_v33 }
  0x37   : > { %5276 = vmatprep.mubr.msk.f32.mxu1 %vm247_vm0, %v6057_v34 }
  0x39   : > { %5253 = vmatmul.mubr.msk.f32.gmra.mxu0 %vm247_vm0, %v6068_v35 }
  0x3a   : > { %5277 = vmatmul.mubr.msk.f32.gmra.mxu1 %vm247_vm0, %v6071_v36  ;;  %5331 = vmatprep.mubr.msk.f32.mxu0 %vm247_vm0, %v1052_v38  ;;  %v6239_v38 = vld [vmem:[%s5909_s9 + $0xc2] sm:$0xff]  ;;  %v6379_v36 = vld [vmem:[%s5909_s9 + $0x16a] sm:$0xff] }
  0x3b   : > { %5281 = vmatprep.mubr.msk.f32.mxu1 %vm247_vm0, %v601_v37  ;;  %v6236_v37 = vld [vmem:[%s5909_s9 + $0xc1] sm:$0xff]  ;;  %7509 = vst [vmem:[#allocation21_spill] sm:$0xff] %v6239_v38  ;;  %7529 = vst [vmem:[#allocation41_spill] sm:$0xff] %v6379_v36 }
  0x3d   : > { %5332 = vmatmul.mubr.msk.f32.vlgmr.msra.gmra.mxu0 %vm247_vm0, %v1053_v40  ;;  %v6253_v40 = vld [vmem:[%s5909_s9 + $0xca] sm:$0xff] }
  0x3e   : > { %5282 = vmatmul.mubr.msk.f32.vlgmr.msra.gmra.mxu1 %vm247_vm0, %v602_v39  ;;  %5430 = vmatpush3.msra.mxu0 %v5939_v10  ;;  %v6233_v10 = vld [vmem:[%s5909_s9 + $0xb2] sm:$0xff]  ;;  %v6250_v39 = vld [vmem:[%s5909_s9 + $0xc9] sm:$0xff]  ;;  %7510 = vst [vmem:[#allocation22_spill] sm:$0xff] %v6253_v40 }
  0x3f   : > { %5380 = vmatpush3.msra.mxu1 %v5934_v9  ;;  %5284 = vmatprep.mubr.msk.f32.mxu1 %vm247_vm0, %v6084_v41  ;;  %v6230_v9 = vld [vmem:[%s5909_s9 + $0xb1] sm:$0xff]  ;;  %7508 = vst [vmem:[#allocation20_spill] sm:$0xff] %v6233_v10 }
  0x40   : > { %5334 = vmatprep.mubr.msk.f32.mxu0 %vm247_vm0, %v6087_v42  ;;  %5479 = vmatprep.subr.mxu1 %v6094_v43  ;;  %v6376_v42 = vld [vmem:[%s5909_s9 + $0x169] sm:$0xff] }
  0x41   : > { %5529 = vmatprep.subr.mxu0 %v6099_v44  ;;  %5335 = vmatmul.mubr.msk.f32.gmra.mxu0 %vm247_vm0, %v6107_v46  ;;  %v6359_v46 = vld [vmem:[%s5909_s9 + $0x152] sm:$0xff] }
  0x42   : > { %5285 = vmatmul.mubr.msk.f32.gmra.mxu1 %vm247_vm0, %v6104_v45  ;;  %5337 = vmatprep.mubr.msk.f32.mxu0 %vm247_vm0, %v6117_v48  ;;  %v6356_v48 = vld [vmem:[%s5909_s9 + $0x151] sm:$0xff]  ;;  %7526 = vst [vmem:[#allocation38_spill] sm:$0xff] %v6359_v46 }
  0x43   : > { %5287 = vmatprep.mubr.msk.f32.mxu1 %vm247_vm0, %v6114_v47  ;;  %7525 = vst [vmem:[#allocation37_spill] sm:$0xff] %v6356_v48 }
  0x45   : > { %5338 = vmatmul.mubr.msk.f32.gmra.mxu0 %vm247_vm0, %v6133_v50  ;;  %v6339_v50 = vld [vmem:[%s5909_s9 + $0x13a] sm:$0xff] }
  0x46   : > { %5288 = vmatmul.mubr.msk.f32.gmra.mxu1 %vm247_vm0, %v6130_v49  ;;  %5340 = vmatprep.mubr.msk.f32.mxu0 %vm247_vm0, %v6139_v52  ;;  %v6336_v52 = vld [vmem:[%s5909_s9 + $0x139] sm:$0xff]  ;;  %7522 = vst [vmem:[#allocation34_spill] sm:$0xff] %v6339_v50 }
  0x47   : > { %5290 = vmatprep.mubr.msk.f32.mxu1 %vm247_vm0, %v6136_v51  ;;  %7521 = vst [vmem:[#allocation33_spill] sm:$0xff] %v6336_v52 }
  0x49   : > { %5341 = vmatmul.mubr.msk.f32.gmra.mxu0 %vm247_vm0, %v6153_v54  ;;  %v6319_v54 = vld [vmem:[%s5909_s9 + $0x122] sm:$0xff] }
  0x4a   : > { %5291 = vmatmul.mubr.msk.f32.gmra.mxu1 %vm247_vm0, %v6150_v53  ;;  %5343 = vmatprep.mubr.msk.f32.mxu0 %vm247_vm0, %v6159_v56  ;;  %v6316_v56 = vld [vmem:[%s5909_s9 + $0x121] sm:$0xff]  ;;  %7518 = vst [vmem:[#allocation30_spill] sm:$0xff] %v6319_v54 }
  0x4b   : > { %5293 = vmatprep.mubr.msk.f32.mxu1 %vm247_vm0, %v6156_v55  ;;  %7517 = vst [vmem:[#allocation29_spill] sm:$0xff] %v6316_v56 }
  0x4d   : > { %5344 = vmatmul.mubr.msk.f32.gmra.mxu0 %vm247_vm0, %v6173_v58  ;;  %v6299_v58 = vld [vmem:[%s5909_s9 + $0x10a] sm:$0xff] }
  0x4e   : > { %5294 = vmatmul.mubr.msk.f32.gmra.mxu1 %vm247_vm0, %v6170_v57  ;;  %5346 = vmatprep.mubr.msk.f32.mxu0 %vm247_vm0, %v6179_v60  ;;  %v6296_v60 = vld [vmem:[%s5909_s9 + $0x109] sm:$0xff]  ;;  %7515 = vst [vmem:[#allocation27_spill] sm:$0xff] %v6299_v58 }
  0x4f   : > { %5296 = vmatprep.mubr.msk.f32.mxu1 %vm247_vm0, %v6176_v59 }
  0x51   : > { %5347 = vmatmul.mubr.msk.f32.gmra.mxu0 %vm247_vm0, %v6193_v62  ;;  %v6279_v62 = vld [vmem:[%s5909_s9 + $0xf2] sm:$0xff] }
  0x52   : > { %5297 = vmatmul.mubr.msk.f32.gmra.mxu1 %vm247_vm0, %v6190_v61  ;;  %5349 = vmatprep.mubr.msk.f32.mxu0 %vm247_vm0, %v6199_v0  ;;  %v6276_v0 = vld [vmem:[%s5909_s9 + $0xf1] sm:$0xff]  ;;  %7513 = vst [vmem:[#allocation25_spill] sm:$0xff] %v6279_v62 }
  0x53   : > { %5299 = vmatprep.mubr.msk.f32.mxu1 %vm247_vm0, %v6196_v63 }
  0x55   : > { %5350 = vmatmul.mubr.msk.f32.gmra.mxu0 %vm247_vm0, %v6213_v2  ;;  %v6259_v2 = vld [vmem:[%s5909_s9 + $0xda] sm:$0xff] }
  0x56   : > { %5300 = vmatmul.mubr.msk.f32.gmra.mxu1 %vm247_vm0, %v6210_v1  ;;  %5352 = vmatprep.mubr.msk.f32.mxu0 %vm247_vm0, %v6219_v5  ;;  %v6256_v5 = vld [vmem:[%s5909_s9 + $0xd9] sm:$0xff]  ;;  %7511 = vst [vmem:[#allocation23_spill] sm:$0xff] %v6259_v2 }
  0x57   : > { %5302 = vmatprep.mubr.msk.f32.mxu1 %vm247_vm0, %v6216_v3 }
  0x59   : > { %5353 = vmatmul.mubr.msk.f32.gmra.mxu0 %vm247_vm0, %v6233_v10  ;;  %v6273_v10 = vld [vmem:[%s5909_s9 + $0xe2] sm:$0xff] }
  0x5a   : > { %5303 = vmatmul.mubr.msk.f32.gmra.mxu1 %vm247_vm0, %v6230_v9  ;;  %5355 = vmatprep.mubr.msk.f32.mxu0 %vm247_vm0, %v6239_v38  ;;  %v6270_v38 = vld [vmem:[%s5909_s9 + $0xe1] sm:$0xff]  ;;  %7512 = vst [vmem:[#allocation24_spill] sm:$0xff] %v6273_v10 }
  0x5b   : > { %5305 = vmatprep.mubr.msk.f32.mxu1 %vm247_vm0, %v6236_v37 }
  0x5d   : > { %5356 = vmatmul.mubr.msk.f32.gmra.mxu0 %vm247_vm0, %v6253_v40  ;;  %v6293_v40 = vld [vmem:[%s5909_s9 + $0xfa] sm:$0xff] }
  0x5e   : > { %5306 = vmatmul.mubr.msk.f32.gmra.mxu1 %vm247_vm0, %v6250_v39  ;;  %5358 = vmatprep.mubr.msk.f32.mxu0 %vm247_vm0, %v6259_v2  ;;  %v6290_v2 = vld [vmem:[%s5909_s9 + $0xf9] sm:$0xff]  ;;  %7514 = vst [vmem:[#allocation26_spill] sm:$0xff] %v6293_v40 }
  0x5f   : > { %5308 = vmatprep.mubr.msk.f32.mxu1 %vm247_vm0, %v6256_v5 }
  0x61   : > { %5359 = vmatmul.mubr.msk.f32.gmra.mxu0 %vm247_vm0, %v6273_v10  ;;  %v6313_v10 = vld [vmem:[%s5909_s9 + $0x112] sm:$0xff] }
  0x62   : > { %5309 = vmatmul.mubr.msk.f32.gmra.mxu1 %vm247_vm0, %v6270_v38  ;;  %5361 = vmatprep.mubr.msk.f32.mxu0 %vm247_vm0, %v6279_v62  ;;  %v6310_v62 = vld [vmem:[%s5909_s9 + $0x111] sm:$0xff]  ;;  %7516 = vst [vmem:[#allocation28_spill] sm:$0xff] %v6313_v10 }
  0x63   : > { %5311 = vmatprep.mubr.msk.f32.mxu1 %vm247_vm0, %v6276_v0 }
  0x65   : > { %5362 = vmatmul.mubr.msk.f32.gmra.mxu0 %vm247_vm0, %v6293_v40  ;;  %v6333_v40 = vld [vmem:[%s5909_s9 + $0x12a] sm:$0xff] }
  0x66   : > { %5312 = vmatmul.mubr.msk.f32.gmra.mxu1 %vm247_vm0, %v6290_v2  ;;  %5364 = vmatprep.mubr.msk.f32.mxu0 %vm247_vm0, %v6299_v58  ;;  %v6330_v58 = vld [vmem:[%s5909_s9 + $0x129] sm:$0xff]  ;;  %7520 = vst [vmem:[#allocation32_spill] sm:$0xff] %v6333_v40 }
  0x67   : > { %5314 = vmatprep.mubr.msk.f32.mxu1 %vm247_vm0, %v6296_v60  ;;  %7519 = vst [vmem:[#allocation31_spill] sm:$0xff] %v6330_v58 }
  0x69   : > { %5365 = vmatmul.mubr.msk.f32.gmra.mxu0 %vm247_vm0, %v6313_v10  ;;  %v6353_v10 = vld [vmem:[%s5909_s9 + $0x142] sm:$0xff] }
  0x6a   : > { %5315 = vmatmul.mubr.msk.f32.gmra.mxu1 %vm247_vm0, %v6310_v62  ;;  %5367 = vmatprep.mubr.msk.f32.mxu0 %vm247_vm0, %v6319_v54  ;;  %v6350_v54 = vld [vmem:[%s5909_s9 + $0x141] sm:$0xff]  ;;  %7524 = vst [vmem:[#allocation36_spill] sm:$0xff] %v6353_v10 }
  0x6b   : > { %5317 = vmatprep.mubr.msk.f32.mxu1 %vm247_vm0, %v6316_v56  ;;  %7523 = vst [vmem:[#allocation35_spill] sm:$0xff] %v6350_v54 }
  0x6d   : > { %5368 = vmatmul.mubr.msk.f32.gmra.mxu0 %vm247_vm0, %v6333_v40  ;;  %v6373_v40 = vld [vmem:[%s5909_s9 + $0x15a] sm:$0xff] }
  0x6e   : > { %5318 = vmatmul.mubr.msk.f32.gmra.mxu1 %vm247_vm0, %v6330_v58  ;;  %5370 = vmatprep.mubr.msk.f32.mxu0 %vm247_vm0, %v6339_v50  ;;  %v6370_v50 = vld [vmem:[%s5909_s9 + $0x159] sm:$0xff]  ;;  %7528 = vst [vmem:[#allocation40_spill] sm:$0xff] %v6373_v40 }
  0x6f   : > { %5320 = vmatprep.mubr.msk.f32.mxu1 %vm247_vm0, %v6336_v52  ;;  %7527 = vst [vmem:[#allocation39_spill] sm:$0xff] %v6370_v50 }
  0x71   : > { %5371 = vmatmul.mubr.msk.f32.gmra.mxu0 %vm247_vm0, %v6353_v10  ;;  %v6393_v10 = vld [vmem:[%s5909_s9 + $0x172] sm:$0xff] }
  0x72   : > { %5321 = vmatmul.mubr.msk.f32.gmra.mxu1 %vm247_vm0, %v6350_v54  ;;  %5373 = vmatprep.mubr.msk.f32.mxu0 %vm247_vm0, %v6359_v46  ;;  %v6390_v46 = vld [vmem:[%s5909_s9 + $0x171] sm:$0xff]  ;;  %7530 = vst [vmem:[#allocation42_spill] sm:$0xff] %v6393_v10 }
  0x73   : > { %5323 = vmatprep.mubr.msk.f32.mxu1 %vm247_vm0, %v6356_v48 }
  0x75   : > { %5374 = vmatmul.mubr.msk.f32.gmra.mxu0 %vm247_vm0, %v6373_v40 }
  0x76   : > { %5324 = vmatmul.mubr.msk.f32.gmra.mxu1 %vm247_vm0, %v6370_v50  ;;  %5376 = vmatprep.mubr.msk.f32.mxu0 %vm247_vm0, %v6379_v36  ;;  %v6410_v36 = vld [vmem:[%s7422_s1 + $0x38] sm:$0xff] }
  0x77   : > { %5326 = vmatprep.mubr.msk.f32.mxu1 %vm247_vm0, %v6376_v42 }
  0x79   : > { %5377 = vmatmul.mubr.msk.f32.gmra.mxu0 %vm247_vm0, %v6393_v10  ;;  %v6415_v10 = vld [vmem:[%s7422_s1 + $0x40] sm:$0xff] }
  0x7a   : > { %5327 = vmatmul.mubr.msk.f32.gmra.mxu1 %vm247_vm0, %v6390_v46  ;;  %5431 = vmatprep.mubr.msk.f32.mxu0 %vm247_vm0, %v6084_v41  ;;  %v7532_v41 = vld [vmem:[#allocation6_spill] sm:$0xff] }
  0x7b   : > { %5381 = vmatprep.mubr.msk.f32.mxu1 %vm247_vm0, %v5923_v7  ;;  %v6530_v7 = vld [vmem:[%s5909_s9 + $0x180] sm:$0xff] }
  0x7d   : > { %5432 = vmatmul.mubr.msk.f32.vlgmr.msra.gmra.mxu0 %vm247_vm0, %v6104_v45  ;;  %v7535_v45 = vld [vmem:[#allocation8_spill] sm:$0xff] }
  0x7e   : > { %5382 = vmatmul.mubr.msk.f32.vlgmr.msra.gmra.mxu1 %vm247_vm0, %v5942_v11  ;;  %5530 = vmatpush3.msra.mxu0 %v6099_v44  ;;  %v6533_v11 = vld [vmem:[%s5909_s9 + $0x181] sm:$0xff]  ;;  %v6547_v44 = vld [vmem:[%s5909_s9 + $0x189] sm:$0xff] }
  0x7f   : > { %5480 = vmatpush3.msra.mxu1 %v6094_v43  ;;  %5384 = vmatprep.mubr.msk.f32.mxu1 %vm247_vm0, %v5952_v13  ;;  %7531 = vst [vmem:[#allocation43_spill] sm:$0xff] %v6533_v11  ;;  %v6544_v43 = vld [vmem:[%s5909_s9 + $0x188] sm:$0xff]  ;;  %7533 = vst [vmem:[#allocation6_spill] sm:$0xff] %v6547_v44 }
  0x80   : > { %5434 = vmatprep.mubr.msk.f32.mxu0 %vm247_vm0, %v6114_v47  ;;  %5579 = vmatprep.subr.mxu1 %v6410_v36 }
  0x81   : > { %5629 = vmatprep.subr.mxu0 %v6415_v10  ;;  %5435 = vmatmul.mubr.msk.f32.gmra.mxu0 %vm247_vm0, %v6130_v49 }
  0x82   : > { %5385 = vmatmul.mubr.msk.f32.gmra.mxu1 %vm247_vm0, %v5968_v15  ;;  %5437 = vmatprep.mubr.msk.f32.mxu0 %vm247_vm0, %v6136_v51 }
  0x83   : > { %5387 = vmatprep.mubr.msk.f32.mxu1 %vm247_vm0, %v5974_v17 }
  0x85   : > { %5438 = vmatmul.mubr.msk.f32.gmra.mxu0 %vm247_vm0, %v6150_v53 }
  0x86   : > { %5388 = vmatmul.mubr.msk.f32.gmra.mxu1 %vm247_vm0, %v5988_v19  ;;  %5440 = vmatprep.mubr.msk.f32.mxu0 %vm247_vm0, %v6156_v55 }
  0x87   : > { %5390 = vmatprep.mubr.msk.f32.mxu1 %vm247_vm0, %v5994_v21 }
  0x89   : > { %5441 = vmatmul.mubr.msk.f32.gmra.mxu0 %vm247_vm0, %v6170_v57 }
  0x8a   : > { %5391 = vmatmul.mubr.msk.f32.gmra.mxu1 %vm247_vm0, %v6008_v23  ;;  %5443 = vmatprep.mubr.msk.f32.mxu0 %vm247_vm0, %v6176_v59 }
  0x8b   : > { %5393 = vmatprep.mubr.msk.f32.mxu1 %vm247_vm0, %v6014_v25 }
  0x8d   : > { %5444 = vmatmul.mubr.msk.f32.gmra.mxu0 %vm247_vm0, %v6190_v61 }
  0x8e   : > { %5394 = vmatmul.mubr.msk.f32.gmra.mxu1 %vm247_vm0, %v6028_v27  ;;  %5446 = vmatprep.mubr.msk.f32.mxu0 %vm247_vm0, %v6196_v63 }
  0x8f   : > { %5396 = vmatprep.mubr.msk.f32.mxu1 %vm247_vm0, %v6034_v29 }
  0x91   : > { %5447 = vmatmul.mubr.msk.f32.gmra.mxu0 %vm247_vm0, %v6210_v1 }
  0x92   : > { %5397 = vmatmul.mubr.msk.f32.gmra.mxu1 %vm247_vm0, %v6048_v31  ;;  %5449 = vmatprep.mubr.msk.f32.mxu0 %vm247_vm0, %v6216_v3 }
  0x93   : > { %5399 = vmatprep.mubr.msk.f32.mxu1 %vm247_vm0, %v6054_v33 }
  0x95   : > { %5450 = vmatmul.mubr.msk.f32.gmra.mxu0 %vm247_vm0, %v6230_v9 }
  0x96   : > { %5400 = vmatmul.mubr.msk.f32.gmra.mxu1 %vm247_vm0, %v6068_v35  ;;  %5452 = vmatprep.mubr.msk.f32.mxu0 %vm247_vm0, %v6236_v37 }
  0x97   : > { %5402 = vmatprep.mubr.msk.f32.mxu1 %vm247_vm0, %v5913_v4 }
  0x99   : > { %5453 = vmatmul.mubr.msk.f32.gmra.mxu0 %vm247_vm0, %v6250_v39 }
  0x9a   : > { %5403 = vmatmul.mubr.msk.f32.gmra.mxu1 %vm247_vm0, %v5920_v6  ;;  %5455 = vmatprep.mubr.msk.f32.mxu0 %vm247_vm0, %v6256_v5 }
  0x9b   : > { %5405 = vmatprep.mubr.msk.f32.mxu1 %vm247_vm0, %v5926_v8 }
  0x9d   : > { %5456 = vmatmul.mubr.msk.f32.gmra.mxu0 %vm247_vm0, %v6270_v38 }
  0x9e   : > { %5406 = vmatmul.mubr.msk.f32.gmra.mxu1 %vm247_vm0, %v5945_v12  ;;  %5458 = vmatprep.mubr.msk.f32.mxu0 %vm247_vm0, %v6276_v0 }
  0x9f   : > { %5408 = vmatprep.mubr.msk.f32.mxu1 %vm247_vm0, %v5955_v14 }
  0xa1   : > { %5459 = vmatmul.mubr.msk.f32.gmra.mxu0 %vm247_vm0, %v6290_v2 }
  0xa2   : > { %5409 = vmatmul.mubr.msk.f32.gmra.mxu1 %vm247_vm0, %v5971_v16  ;;  %5461 = vmatprep.mubr.msk.f32.mxu0 %vm247_vm0, %v6296_v60 }
  0xa3   : > { %5411 = vmatprep.mubr.msk.f32.mxu1 %vm247_vm0, %v5977_v18 }
  0xa5   : > { %5462 = vmatmul.mubr.msk.f32.gmra.mxu0 %vm247_vm0, %v6310_v62 }
  0xa6   : > { %5412 = vmatmul.mubr.msk.f32.gmra.mxu1 %vm247_vm0, %v5991_v20  ;;  %5464 = vmatprep.mubr.msk.f32.mxu0 %vm247_vm0, %v6316_v56 }
  0xa7   : > { %5414 = vmatprep.mubr.msk.f32.mxu1 %vm247_vm0, %v5997_v22 }
  0xa9   : > { %5465 = vmatmul.mubr.msk.f32.gmra.mxu0 %vm247_vm0, %v6330_v58 }
  0xaa   : > { %5415 = vmatmul.mubr.msk.f32.gmra.mxu1 %vm247_vm0, %v6011_v24  ;;  %5467 = vmatprep.mubr.msk.f32.mxu0 %vm247_vm0, %v6336_v52  ;;  %v7558_v52 = vld [vmem:[#allocation28_spill] sm:$0xff] }
  0xab   : > { %5417 = vmatprep.mubr.msk.f32.mxu1 %vm247_vm0, %v6017_v26 }
  0xad   : > { %5468 = vmatmul.mubr.msk.f32.gmra.mxu0 %vm247_vm0, %v6350_v54 }
  0xae   : > { %5418 = vmatmul.mubr.msk.f32.gmra.mxu1 %vm247_vm0, %v6031_v28  ;;  %5470 = vmatprep.mubr.msk.f32.mxu0 %vm247_vm0, %v6356_v48 }
  0xaf   : > { %5420 = vmatprep.mubr.msk.f32.mxu1 %vm247_vm0, %v6037_v30 }
  0xb1   : > { %5471 = vmatmul.mubr.msk.f32.gmra.mxu0 %vm247_vm0, %v6370_v50 }
  0xb2   : > { %5421 = vmatmul.mubr.msk.f32.gmra.mxu1 %vm247_vm0, %v6051_v32  ;;  %5473 = vmatprep.mubr.msk.f32.mxu0 %vm247_vm0, %v6376_v42  ;;  %v7534_v42 = vld [vmem:[#allocation7_spill] sm:$0xff] }
  0xb3   : > { %5423 = vmatprep.mubr.msk.f32.mxu1 %vm247_vm0, %v6057_v34 }
  0xb5   : > { %5474 = vmatmul.mubr.msk.f32.gmra.mxu0 %vm247_vm0, %v6390_v46  ;;  %v7536_v46 = vld [vmem:[#allocation9_spill] sm:$0xff] }
  0xb6   : > { %5424 = vmatmul.mubr.msk.f32.gmra.mxu1 %vm247_vm0, %v7532_v41  ;;  %5476 = vmatprep.mubr.msk.f32.mxu0 %vm247_vm0, %v6533_v11  ;;  %v7554_v11 = vld [vmem:[#allocation26_spill] sm:$0xff] }
  0xb7   : > { %5426 = vmatprep.mubr.msk.f32.mxu1 %vm247_vm0, %v6530_v7 }
  0xb9   : > { %5477 = vmatmul.mubr.msk.f32.gmra.mxu0 %vm247_vm0, %v6547_v44 }
  0xba   : > { %5427 = vmatmul.mubr.msk.f32.gmra.mxu1 %vm247_vm0, %v6544_v43  ;;  %5531 = vmatprep.mubr.msk.f32.mxu0 %vm247_vm0, %v5952_v13  ;;  %v7538_v13 = vld [vmem:[#allocation11_spill] sm:$0xff] }
  0xbb   : > { %5481 = vmatprep.mubr.msk.f32.mxu1 %vm247_vm0, %v7534_v42  ;;  %v7537_v42 = vld [vmem:[#allocation10_spill] sm:$0xff] }
  0xbd   : > { %5532 = vmatmul.mubr.msk.f32.vlgmr.msra.gmra.mxu0 %vm247_vm0, %v5968_v15  ;;  %v7539_v15 = vld [vmem:[#allocation12_spill] sm:$0xff] }
  0xbe   : > { %5482 = vmatmul.mubr.msk.f32.vlgmr.msra.gmra.mxu1 %vm247_vm0, %v7535_v45  ;;  %5630 = vmatpush3.msra.mxu0 %v6415_v10  ;;  %v7551_v10 = vld [vmem:[#allocation24_spill] sm:$0xff] }
  0xbf   : > { %5580 = vmatpush3.msra.mxu1 %v6410_v36  ;;  %5484 = vmatprep.mubr.msk.f32.mxu1 %vm247_vm0, %v7536_v46  ;;  %v7540_v36 = vld [vmem:[#allocation13_spill] sm:$0xff] }
  0xc0   : > { %5534 = vmatprep.mubr.msk.f32.mxu0 %vm247_vm0, %v5974_v17  ;;  %v7541_v17 = vld [vmem:[#allocation14_spill] sm:$0xff] }
  0xc1   : > { %5535 = vmatmul.mubr.msk.f32.gmra.mxu0 %vm247_vm0, %v5988_v19  ;;  %v7542_v19 = vld [vmem:[#allocation15_spill] sm:$0xff] }
  0xc2   : > { %5485 = vmatmul.mubr.msk.f32.gmra.mxu1 %vm247_vm0, %v7537_v42  ;;  %5537 = vmatprep.mubr.msk.f32.mxu0 %vm247_vm0, %v5994_v21  ;;  %v7543_v21 = vld [vmem:[#allocation16_spill] sm:$0xff] }
  0xc3   : > { %5487 = vmatprep.mubr.msk.f32.mxu1 %vm247_vm0, %v7538_v13 }
  0xc5   : > { %5538 = vmatmul.mubr.msk.f32.gmra.mxu0 %vm247_vm0, %v6008_v23  ;;  %v7544_v23 = vld [vmem:[#allocation17_spill] sm:$0xff] }
  0xc6   : > { %5488 = vmatmul.mubr.msk.f32.gmra.mxu1 %vm247_vm0, %v7539_v15  ;;  %5540 = vmatprep.mubr.msk.f32.mxu0 %vm247_vm0, %v6014_v25  ;;  %v7545_v25 = vld [vmem:[#allocation18_spill] sm:$0xff] }
  0xc7   : > { %5490 = vmatprep.mubr.msk.f32.mxu1 %vm247_vm0, %v7540_v36 }
  0xc9   : > { %5541 = vmatmul.mubr.msk.f32.gmra.mxu0 %vm247_vm0, %v6028_v27  ;;  %v7546_v27 = vld [vmem:[#allocation19_spill] sm:$0xff] }
  0xca   : > { %5491 = vmatmul.mubr.msk.f32.gmra.mxu1 %vm247_vm0, %v7541_v17  ;;  %5543 = vmatprep.mubr.msk.f32.mxu0 %vm247_vm0, %v6034_v29  ;;  %v7547_v29 = vld [vmem:[#allocation20_spill] sm:$0xff] }
  0xcb   : > { %5493 = vmatprep.mubr.msk.f32.mxu1 %vm247_vm0, %v7542_v19 }
  0xcd   : > { %5544 = vmatmul.mubr.msk.f32.gmra.mxu0 %vm247_vm0, %v6048_v31  ;;  %v7548_v31 = vld [vmem:[#allocation21_spill] sm:$0xff] }
  0xce   : > { %5494 = vmatmul.mubr.msk.f32.gmra.mxu1 %vm247_vm0, %v7543_v21  ;;  %5546 = vmatprep.mubr.msk.f32.mxu0 %vm247_vm0, %v6054_v33  ;;  %v7549_v33 = vld [vmem:[#allocation22_spill] sm:$0xff] }
  0xcf   : > { %5496 = vmatprep.mubr.msk.f32.mxu1 %vm247_vm0, %v7544_v23 }
  0xd1   : > { %5547 = vmatmul.mubr.msk.f32.gmra.mxu0 %vm247_vm0, %v6068_v35  ;;  %v7550_v35 = vld [vmem:[#allocation23_spill] sm:$0xff] }
  0xd2   : > { %5497 = vmatmul.mubr.msk.f32.gmra.mxu1 %vm247_vm0, %v7545_v25  ;;  %5549 = vmatprep.mubr.msk.f32.mxu0 %vm247_vm0, %v5913_v4 }
  0xd3   : > { %5499 = vmatprep.mubr.msk.f32.mxu1 %vm247_vm0, %v7546_v27 }
  0xd5   : > { %5550 = vmatmul.mubr.msk.f32.gmra.mxu0 %vm247_vm0, %v5920_v6 }
  0xd6   : > { %5500 = vmatmul.mubr.msk.f32.gmra.mxu1 %vm247_vm0, %v7547_v29  ;;  %5552 = vmatprep.mubr.msk.f32.mxu0 %vm247_vm0, %v5926_v8  ;;  %v7552_v8 = vld [vmem:[#allocation25_spill] sm:$0xff] }
  0xd7   : > { %5502 = vmatprep.mubr.msk.f32.mxu1 %vm247_vm0, %v7548_v31 }
  0xd9   : > { %5553 = vmatmul.mubr.msk.f32.gmra.mxu0 %vm247_vm0, %v5945_v12 }
  0xda   : > { %5503 = vmatmul.mubr.msk.f32.gmra.mxu1 %vm247_vm0, %v7549_v33  ;;  %5555 = vmatprep.mubr.msk.f32.mxu0 %vm247_vm0, %v5955_v14 }
  0xdb   : > { %5505 = vmatprep.mubr.msk.f32.mxu1 %vm247_vm0, %v7550_v35 }
  0xdd   : > { %v6623_v4 = vpop.f32.mrf.mxu0  ;;  %5556 = vmatmul.mubr.msk.f32.gmra.mxu0 %vm247_vm0, %v5971_v16  ;;  %v7555_v16 = vld [vmem:[#allocation27_spill] sm:$0xff] }
  0xde   : > { %v6625_v6 = vpop.f32.mrf.mxu1  ;;  %5506 = vmatmul.mubr.msk.f32.gmra.mxu1 %vm247_vm0, %v7551_v10  ;;  %5558 = vmatprep.mubr.msk.f32.mxu0 %vm247_vm0, %v5977_v18 }
  0xdf   : > { %5508 = vmatprep.mubr.msk.f32.mxu1 %vm247_vm0, %v7552_v8  ;;  %v6635_v12 = vpop.f32.mrf.mxu0 }
  0xe0   : > { %v6637_v45 = vpop.f32.mrf.mxu1 }
  0xe1   : > { %v6639_v14 = vpop.f32.mrf.mxu0  ;;  %5559 = vmatmul.mubr.msk.f32.gmra.mxu0 %vm247_vm0, %v5991_v20  ;;  %v7559_v20 = vld [vmem:[#allocation30_spill] sm:$0xff] }
  0xe2   : > { %v6641_v44 = vpop.f32.mrf.mxu1  ;;  %5509 = vmatmul.mubr.msk.f32.gmra.mxu1 %vm247_vm0, %v7554_v11  ;;  %5561 = vmatprep.mubr.msk.f32.mxu0 %vm247_vm0, %v5997_v22 }
  0xe3   : > { %7553 = vst [vmem:[#allocation7_spill] sm:$0xff] %v6641_v44  ;;  %5511 = vmatprep.mubr.msk.f32.mxu1 %vm247_vm0, %v7555_v16  ;;  %v6651_v18 = vpop.f32.mrf.mxu0  ;;  %v7566_v44 = vld [vmem:[#allocation36_spill] sm:$0xff] }
  0xe4   : > { %v6653_v50 = vpop.f32.mrf.mxu1 }
  0xe5   : > { %7556 = vst [vmem:[#allocation8_spill] sm:$0xff] %v6653_v50  ;;  %v6655_v48 = vpop.f32.mrf.mxu0  ;;  %5562 = vmatmul.mubr.msk.f32.gmra.mxu0 %vm247_vm0, %v6011_v24  ;;  %v7563_v24 = vld [vmem:[#allocation34_spill] sm:$0xff] }
  0xe6   : > { %v6657_v54 = vpop.f32.mrf.mxu1  ;;  %5512 = vmatmul.mubr.msk.f32.gmra.mxu1 %vm247_vm0, %v7558_v52  ;;  %5564 = vmatprep.mubr.msk.f32.mxu0 %vm247_vm0, %v6017_v26 }
  0xe7   : > { %7557 = vst [vmem:[#allocation9_spill] sm:$0xff] %v6657_v54  ;;  %5514 = vmatprep.mubr.msk.f32.mxu1 %vm247_vm0, %v7559_v20  ;;  %v6667_v22 = vpop.f32.mrf.mxu0  ;;  %v7562_v54 = vld [vmem:[#allocation32_spill] sm:$0xff] }
  0xe8   : > { %v6669_v58 = vpop.f32.mrf.mxu1 }
  0xe9   : > { %7560 = vst [vmem:[#allocation10_spill] sm:$0xff] %v6669_v58  ;;  %v6671_v50 = vpop.f32.mrf.mxu0  ;;  %5565 = vmatmul.mubr.msk.f32.gmra.mxu0 %vm247_vm0, %v6031_v28  ;;  %v7567_v28 = vld [vmem:[#allocation38_spill] sm:$0xff] }
  0xea   : > { %v6673_v56 = vpop.f32.mrf.mxu1  ;;  %5515 = vmatmul.mubr.msk.f32.gmra.mxu1 %vm247_vm0, %v7562_v54  ;;  %5567 = vmatprep.mubr.msk.f32.mxu0 %vm247_vm0, %v6037_v30 }
  0xeb   : > { %7561 = vst [vmem:[#allocation11_spill] sm:$0xff] %v6673_v56  ;;  %5517 = vmatprep.mubr.msk.f32.mxu1 %vm247_vm0, %v7563_v24  ;;  %v6683_v26 = vpop.f32.mrf.mxu0 }
  0xec   : > { %v6685_v20 = vpop.f32.mrf.mxu1 }
  0xed   : > { %7564 = vst [vmem:[#allocation12_spill] sm:$0xff] %v6685_v20  ;;  %v6687_v58 = vpop.f32.mrf.mxu0  ;;  %5568 = vmatmul.mubr.msk.f32.gmra.mxu0 %vm247_vm0, %v6051_v32  ;;  %v7570_v32 = vld [vmem:[#allocation41_spill] sm:$0xff] }
  0xee   : > { %v6689_v56 = vpop.f32.mrf.mxu1  ;;  %5518 = vmatmul.mubr.msk.f32.gmra.mxu1 %vm247_vm0, %v7566_v44  ;;  %5570 = vmatprep.mubr.msk.f32.mxu0 %vm247_vm0, %v6057_v34 }
  0xef   : > { %7565 = vst [vmem:[#allocation13_spill] sm:$0xff] %v6689_v56  ;;  %5520 = vmatprep.mubr.msk.f32.mxu1 %vm247_vm0, %v7567_v28  ;;  %v6699_v30 = vpop.f32.mrf.mxu0  ;;  %v6720_v28 = vld [vmem:[%s5909_s9 + $0x182] sm:$0xff] }
  0xf0   : > { %v6701_v20 = vpop.f32.mrf.mxu1  ;;  %7572 = vst [vmem:[#allocation17_spill] sm:$0xff] %v6720_v28 }
  0xf1   : > { %7568 = vst [vmem:[#allocation14_spill] sm:$0xff] %v6701_v20  ;;  %v6703_v24 = vpop.f32.mrf.mxu0  ;;  %5571 = vmatmul.mubr.msk.f32.gmra.mxu0 %vm247_vm0, %v7532_v41  ;;  %v4761_v41 = vld [vmem:[%s5909_s9 + $0x1a0] sm:$0xff] }
  0xf2   : > { %v6705_v56 = vpop.f32.mrf.mxu1  ;;  %5521 = vmatmul.mubr.msk.f32.gmra.mxu1 %vm247_vm0, %v6373_v40  ;;  %5573 = vmatprep.mubr.msk.f32.mxu0 %vm247_vm0, %v6530_v7  ;;  %v7574_v40 = vld [vmem:[#allocation42_spill] sm:$0xff]  ;;  %v6735_v7 = vld [vmem:[%s5909_s9 + $0x18a] sm:$0xff] }
  0xf3   : > { %7569 = vst [vmem:[#allocation15_spill] sm:$0xff] %v6705_v56  ;;  %5523 = vmatprep.mubr.msk.f32.mxu1 %vm247_vm0, %v7570_v32  ;;  %v6715_v34 = vpop.f32.mrf.mxu0  ;;  %v4760_v56 = vld [vmem:[%s5909_s9 + $0x198] sm:$0xff]  ;;  %7575 = vst [vmem:[#allocation19_spill] sm:$0xff] %v6735_v7 }
  0xf4   : > { %v6717_v20 = vpop.f32.mrf.mxu1 }
  0xf5   : > { %7571 = vst [vmem:[#allocation16_spill] sm:$0xff] %v6717_v20  ;;  %v6723_v44 = vpop.f32.mrf.mxu0  ;;  %5574 = vmatmul.mubr.msk.f32.gmra.mxu0 %vm247_vm0, %v6544_v43 }
  0xf6   : > { %v6725_v54 = vpop.f32.mrf.mxu1  ;;  %5524 = vmatmul.mubr.msk.f32.gmra.mxu1 %vm247_vm0, %v7574_v40  ;;  %5576 = vmatprep.mubr.msk.f32.mxu0 %vm247_vm0, %v4760_v56 }
  0xf7   : > { %7573 = vst [vmem:[#allocation18_spill] sm:$0xff] %v6725_v54  ;;  %5526 = vmatprep.mubr.msk.f32.mxu1 %vm247_vm0, %v6720_v28  ;;  %v6738_v32 = vpop.f32.mrf.mxu0 }
  0xf8   : > { %v6740_v20 = vpop.f32.mrf.mxu1 }
  0xf9   : > { %7576 = vst [vmem:[#allocation20_spill] sm:$0xff] %v6740_v20  ;;  %v6742_v52 = vpop.f32.mrf.mxu0  ;;  %5577 = vmatmul.mubr.msk.f32.gmra.mxu0 %vm247_vm0, %v4761_v41 }
  0xfa   : > { %v6744_v54 = vpop.f32.mrf.mxu1  ;;  %5527 = vmatmul.mubr.msk.f32.gmra.mxu1 %vm247_vm0, %v6735_v7  ;;  %5631 = vmatprep.mubr.msk.f32.mxu0 %vm247_vm0, %v7536_v46 }
  0xfb   : > { %7577 = vst [vmem:[#allocation21_spill] sm:$0xff] %v6744_v54  ;;  %5581 = vmatprep.mubr.msk.f32.mxu1 %vm247_vm0, %v6114_v47  ;;  %v6753_v56 = vpop.f32.mrf.mxu0 }
  0xfc   : > { %v6755_v40 = vpop.f32.mrf.mxu1 }
  0xfd   : > { %7578 = vst [vmem:[#allocation22_spill] sm:$0xff] %v6755_v40  ;;  %v5333_v20 = vpop.f32.mrf.mxu0  ;;  %5632 = vmatmul.mubr.msk.f32.vlgmr.msra.gmra.mxu0 %vm247_vm0, %v7537_v42 }
  0xfe   : > { %v5283_v43 = vpop.f32.mrf.mxu1  ;;  %5582 = vmatmul.mubr.msk.f32.vlgmr.msra.gmra.mxu1 %vm247_vm0, %v6130_v49  ;;  %5634 = vmatprep.mubr.msk.f32.mxu0 %vm247_vm0, %v7538_v13 }
  0xff   : > { %v989_v41 = vadd.f32 %v5283_v43, %v6623_v4  ;;  %5584 = vmatprep.mubr.msk.f32.mxu1 %vm247_vm0, %v6136_v51  ;;  %v1248_v46 = vpop.f32.mrf.mxu0 }
 0x100   : > { %v797_v47 = vpop.f32.mrf.mxu1 }
 0x101   : > { %v6766_v54 = vadd.f32 %v5333_v20, %v989_v41  ;;  %v988_v40 = vadd.f32 %v797_v47, %v6635_v12  ;;  %v5336_v28 = vpop.f32.mrf.mxu0  ;;  %5635 = vmatmul.mubr.msk.f32.gmra.mxu0 %vm247_vm0, %v7539_v15 }
 0x102   : > { %v5286_v7 = vpop.f32.mrf.mxu1  ;;  %5585 = vmatmul.mubr.msk.f32.gmra.mxu1 %vm247_vm0, %v6150_v53  ;;  %5637 = vmatprep.mubr.msk.f32.mxu0 %vm247_vm0, %v7540_v36 }
 0x103   : > { %v6773_v49 = vadd.f32 %v1248_v46, %v988_v40  ;;  %v991_v51 = vadd.f32 %v5286_v7, %v6639_v14  ;;  %5587 = vmatprep.mubr.msk.f32.mxu1 %vm247_vm0, %v6156_v55  ;;  %v1258_v13 = vpop.f32.mrf.mxu0 }
 0x104   : > { %v807_v42 = vpop.f32.mrf.mxu1 }
 0x105   : > { %v6780_v4 = vadd.f32 %v5336_v28, %v991_v51  ;;  %v990_v12 = vadd.f32 %v807_v42, %v6651_v18  ;;  %v5339_v20 = vpop.f32.mrf.mxu0  ;;  %5638 = vmatmul.mubr.msk.f32.gmra.mxu0 %vm247_vm0, %v7541_v17 }
 0x106   : > { %v5289_v53 = vpop.f32.mrf.mxu1  ;;  %5588 = vmatmul.mubr.msk.f32.gmra.mxu1 %vm247_vm0, %v6170_v57  ;;  %5640 = vmatprep.mubr.msk.f32.mxu0 %vm247_vm0, %v7542_v19 }
 0x107   : > { %v6787_v15 = vadd.f32 %v1258_v13, %v990_v12  ;;  %v993_v55 = vadd.f32 %v5289_v53, %v6655_v48  ;;  %5590 = vmatprep.mubr.msk.f32.mxu1 %vm247_vm0, %v6176_v59  ;;  %v1268_v14 = vpop.f32.mrf.mxu0 }
 0x108   : > { %v817_v36 = vpop.f32.mrf.mxu1 }
 0x109   : > { %v6794_v18 = vadd.f32 %v5339_v20, %v993_v55  ;;  %v992_v28 = vadd.f32 %v817_v36, %v6667_v22  ;;  %v5342_v7 = vpop.f32.mrf.mxu0  ;;  %5641 = vmatmul.mubr.msk.f32.gmra.mxu0 %vm247_vm0, %v7543_v21 }
 0x10a   : > { %v5292_v57 = vpop.f32.mrf.mxu1  ;;  %5591 = vmatmul.mubr.msk.f32.gmra.mxu1 %vm247_vm0, %v6190_v61  ;;  %5643 = vmatprep.mubr.msk.f32.mxu0 %vm247_vm0, %v7544_v23 }
 0x10b   : > { %v6801_v48 = vadd.f32 %v1268_v14, %v992_v28  ;;  %v995_v59 = vadd.f32 %v5292_v57, %v6671_v50  ;;  %5593 = vmatprep.mubr.msk.f32.mxu1 %vm247_vm0, %v6196_v63  ;;  %v1278_v19 = vpop.f32.mrf.mxu0  ;;  %v7581_v14 = vld [vmem:[#allocation29_spill] sm:$0xff] }
 0x10c   : > { %v827_v17 = vpop.f32.mrf.mxu1 }
 0x10d   : > { %v6808_v22 = vadd.f32 %v5342_v7, %v995_v59  ;;  %v994_v40 = vadd.f32 %v827_v17, %v6683_v26  ;;  %v5345_v43 = vpop.f32.mrf.mxu0  ;;  %5644 = vmatmul.mubr.msk.f32.gmra.mxu0 %vm247_vm0, %v7545_v25  ;;  %v7583_v7 = vld [vmem:[#allocation8_spill] sm:$0xff] }
 0x10e   : > { %v5295_v61 = vpop.f32.mrf.mxu1  ;;  %5594 = vmatmul.mubr.msk.f32.gmra.mxu1 %vm247_vm0, %v6210_v1  ;;  %5646 = vmatprep.mubr.msk.f32.mxu0 %vm247_vm0, %v7546_v27 }
 0x10f   : > { %v6815_v50 = vadd.f32 %v1278_v19, %v994_v40  ;;  %v997_v63 = vadd.f32 %v5295_v61, %v6687_v58  ;;  %5596 = vmatprep.mubr.msk.f32.mxu1 %vm247_vm0, %v6216_v3  ;;  %v1288_v23 = vpop.f32.mrf.mxu0  ;;  %v7584_v19 = vld [vmem:[#allocation31_spill] sm:$0xff]  ;;  %v7585_v40 = vld [vmem:[#allocation32_spill] sm:$0xff] }
 0x110   : > { %v837_v21 = vpop.f32.mrf.mxu1 }
 0x111   : > { %v6822_v26 = vadd.f32 %v5345_v43, %v997_v63  ;;  %v996_v41 = vadd.f32 %v837_v21, %v6699_v30  ;;  %v5348_v47 = vpop.f32.mrf.mxu0  ;;  %5647 = vmatmul.mubr.msk.f32.gmra.mxu0 %vm247_vm0, %v7547_v29  ;;  %v7586_v43 = vld [vmem:[#allocation9_spill] sm:$0xff] }
 0x112   : > { %v5298_v1 = vpop.f32.mrf.mxu1  ;;  %5597 = vmatmul.mubr.msk.f32.gmra.mxu1 %vm247_vm0, %v6230_v9  ;;  %5649 = vmatprep.mubr.msk.f32.mxu0 %vm247_vm0, %v7548_v31  ;;  %v7587_v21 = vld [vmem:[#allocation33_spill] sm:$0xff] }
 0x113   : > { %v6829_v58 = vadd.f32 %v1288_v23, %v996_v41  ;;  %v999_v3 = vadd.f32 %v5298_v1, %v6703_v24  ;;  %5599 = vmatprep.mubr.msk.f32.mxu1 %vm247_vm0, %v6236_v37  ;;  %v1298_v27 = vpop.f32.mrf.mxu0  ;;  %v7588_v23 = vld [vmem:[#allocation34_spill] sm:$0xff] }
 0x114   : > { %v847_v25 = vpop.f32.mrf.mxu1 }
 0x115   : > { %v6836_v30 = vadd.f32 %v5348_v47, %v999_v3  ;;  %v998_v46 = vadd.f32 %v847_v25, %v6715_v34  ;;  %v5351_v51 = vpop.f32.mrf.mxu0  ;;  %5650 = vmatmul.mubr.msk.f32.gmra.mxu0 %vm247_vm0, %v7549_v33  ;;  %v7589_v3 = vld [vmem:[#allocation10_spill] sm:$0xff] }
 0x116   : > { %v5301_v9 = vpop.f32.mrf.mxu1  ;;  %5600 = vmatmul.mubr.msk.f32.gmra.mxu1 %vm247_vm0, %v6250_v39  ;;  %5652 = vmatprep.mubr.msk.f32.mxu0 %vm247_vm0, %v7550_v35 }
 0x117   : > { %v6843_v29 = vadd.f32 %v1298_v27, %v998_v46  ;;  %v1001_v37 = vadd.f32 %v5301_v9, %v6723_v44  ;;  %5602 = vmatprep.mubr.msk.f32.mxu1 %vm247_vm0, %v6256_v5  ;;  %v1308_v24 = vpop.f32.mrf.mxu0  ;;  %v7590_v9 = vld [vmem:[#allocation35_spill] sm:$0xff] }
 0x118   : > { %v857_v31 = vpop.f32.mrf.mxu1 }
 0x119   : > { %v6850_v34 = vadd.f32 %v5351_v51, %v1001_v37  ;;  %v1000_v42 = vadd.f32 %v857_v31, %v6738_v32  ;;  %v5354_v13 = vpop.f32.mrf.mxu0  ;;  %5653 = vmatmul.mubr.msk.f32.gmra.mxu0 %vm247_vm0, %v7551_v10  ;;  %v7591_v51 = vld [vmem:[#allocation36_spill] sm:$0xff]  ;;  %v7592_v31 = vld [vmem:[#allocation11_spill] sm:$0xff] }
 0x11a   : > { %v5304_v39 = vpop.f32.mrf.mxu1  ;;  %5603 = vmatmul.mubr.msk.f32.gmra.mxu1 %vm247_vm0, %v6270_v38  ;;  %5655 = vmatprep.mubr.msk.f32.mxu0 %vm247_vm0, %v7552_v8 }
 0x11b   : > { %v6857_v44 = vadd.f32 %v1308_v24, %v1000_v42  ;;  %v1003_v5 = vadd.f32 %v5304_v39, %v6742_v52  ;;  %5605 = vmatprep.mubr.msk.f32.mxu1 %vm247_vm0, %v6276_v0  ;;  %v1318_v35 = vpop.f32.mrf.mxu0  ;;  %v7593_v42 = vld [vmem:[#allocation37_spill] sm:$0xff]  ;;  %v7594_v39 = vld [vmem:[#allocation38_spill] sm:$0xff] }
 0x11c   : > { %v867_v33 = vpop.f32.mrf.mxu1 }
 0x11d   : > { %v6864_v32 = vadd.f32 %v5354_v13, %v1003_v5  ;;  %v1002_v12 = vadd.f32 %v867_v33, %v6753_v56  ;;  %v5357_v53 = vpop.f32.mrf.mxu0  ;;  %5656 = vmatmul.mubr.msk.f32.gmra.mxu0 %vm247_vm0, %v7554_v11  ;;  %v7579_v11 = vld [vmem:[#allocation28_spill] sm:$0xff] }
 0x11e   : > { %v5307_v38 = vpop.f32.mrf.mxu1  ;;  %5606 = vmatmul.mubr.msk.f32.gmra.mxu1 %vm247_vm0, %v6290_v2  ;;  %5658 = vmatprep.mubr.msk.f32.mxu0 %vm247_vm0, %v7555_v16  ;;  %v7582_v16 = vld [vmem:[#allocation30_spill] sm:$0xff]  ;;  %v4821_v33 = vld [vmem:[%s5909_s9 + $0x169] sm:$0xff] }
 0x11f   : > { %v6871_v52 = vadd.f32 %v1318_v35, %v1002_v12  ;;  %v1005_v0 = vadd.f32 %v5307_v38, %v6625_v6  ;;  %5608 = vmatprep.mubr.msk.f32.mxu1 %vm247_vm0, %v6296_v60  ;;  %v1328_v8 = vpop.f32.mrf.mxu0  ;;  %v7580_v60 = vld [vmem:[#allocation7_spill] sm:$0xff]  ;;  %v7595_v38 = vld [vmem:[#allocation12_spill] sm:$0xff] }
 0x120   : > { %v877_v10 = vpop.f32.mrf.mxu1  ;;  %v4886_v35 = vld [vmem:[%s5909_s9 + $0x16a] sm:$0xff] }
 0x121   : > { %v6878_v56 = vadd.f32 %v5357_v53, %v1005_v0  ;;  %v1004_v20 = vadd.f32 %v877_v10, %v6637_v45  ;;  %v5360_v55 = vpop.f32.mrf.mxu0  ;;  %5659 = vmatmul.mubr.msk.f32.gmra.mxu0 %vm247_vm0, %v7579_v11 }
 0x122   : > { %v5310_v2 = vpop.f32.mrf.mxu1  ;;  %5609 = vmatmul.mubr.msk.f32.gmra.mxu1 %vm247_vm0, %v6310_v62  ;;  %5661 = vmatprep.mubr.msk.f32.mxu0 %vm247_vm0, %v7582_v16 }
 0x123   : > { %v6885_v6 = vadd.f32 %v1328_v8, %v1004_v20  ;;  %v1007_v36 = vadd.f32 %v5310_v2, %v7580_v60  ;;  %5611 = vmatprep.mubr.msk.f32.mxu1 %vm247_vm0, %v7581_v14  ;;  %v1338_v45 = vpop.f32.mrf.mxu0  ;;  %v7596_v8 = vld [vmem:[#allocation39_spill] sm:$0xff]  ;;  %v7597_v20 = vld [vmem:[#allocation40_spill] sm:$0xff] }
 0x124   : > { %v887_v28 = vpop.f32.mrf.mxu1  ;;  %v4822_v60 = vld [vmem:[%s5909_s9 + $0x171] sm:$0xff] }
 0x125   : > { %v6892_v57 = vadd.f32 %v5360_v55, %v1007_v36  ;;  %v1006_v59 = vadd.f32 %v887_v28, %v7583_v7  ;;  %v5363_v17 = vpop.f32.mrf.mxu0  ;;  %5662 = vmatmul.mubr.msk.f32.gmra.mxu0 %vm247_vm0, %v7585_v40  ;;  %v7598_v55 = vld [vmem:[#allocation13_spill] sm:$0xff] }
 0x126   : > { %v5313_v62 = vpop.f32.mrf.mxu1  ;;  %5612 = vmatmul.mubr.msk.f32.gmra.mxu1 %vm247_vm0, %v7584_v19  ;;  %5664 = vmatprep.mubr.msk.f32.mxu0 %vm247_vm0, %v7588_v23  ;;  %v4887_v36 = vld [vmem:[%s5909_s9 + $0x172] sm:$0xff]  ;;  %v7600_v19 = vld [vmem:[#allocation15_spill] sm:$0xff] }
 0x127   : > { %v6899_v61 = vadd.f32 %v1338_v45, %v1006_v59  ;;  %v1009_v63 = vadd.f32 %v5313_v62, %v7586_v43  ;;  %5614 = vmatprep.mubr.msk.f32.mxu1 %vm247_vm0, %v7587_v21  ;;  %v1348_v1 = vpop.f32.mrf.mxu0  ;;  %v7599_v45 = vld [vmem:[#allocation14_spill] sm:$0xff]  ;;  %v7601_v43 = vld [vmem:[#allocation43_spill] sm:$0xff] }
 0x128   : > { %v897_v41 = vpop.f32.mrf.mxu1 }
 0x129   : > { %v6906_v47 = vadd.f32 %v5363_v17, %v1009_v63  ;;  %v1008_v25 = vadd.f32 %v897_v41, %v7589_v3  ;;  %v5366_v46 = vpop.f32.mrf.mxu0  ;;  %5665 = vmatmul.mubr.msk.f32.gmra.mxu0 %vm247_vm0, %v7591_v51  ;;  %v7602_v63 = vld [vmem:[#allocation17_spill] sm:$0xff]  ;;  %v7604_v51 = vld [vmem:[#allocation6_spill] sm:$0xff] }
 0x12a   : > { %v5316_v27 = vpop.f32.mrf.mxu1  ;;  %5615 = vmatmul.mubr.msk.f32.gmra.mxu1 %vm247_vm0, %v7590_v9  ;;  %5667 = vmatprep.mubr.msk.f32.mxu0 %vm247_vm0, %v7594_v39  ;;  %v4825_v41 = vld [vmem:[%s5909_s9 + $0x199] sm:$0xff] }
 0x12b   : > { %v6913_v37 = vadd.f32 %v1348_v1, %v1008_v25  ;;  %v1011_v24 = vadd.f32 %v5316_v27, %v7592_v31  ;;  %5617 = vmatprep.mubr.msk.f32.mxu1 %vm247_vm0, %v7593_v42  ;;  %v1358_v5 = vpop.f32.mrf.mxu0  ;;  %v4890_v1 = vld [vmem:[%s5909_s9 + $0x19a] sm:$0xff]  ;;  %v7603_v25 = vld [vmem:[#allocation16_spill] sm:$0xff]  ;;  %v7605_v31 = vld [vmem:[#allocation19_spill] sm:$0xff] }
 0x12c   : > { %v907_v13 = vpop.f32.mrf.mxu1  ;;  %v7606_v42 = vld [vmem:[#allocation18_spill] sm:$0xff] }
 0x12d   : > { %v6922_v12 = vadd.f32 %v5366_v46, %v1011_v24  ;;  %v1010_v53 = vadd.f32 %v907_v13, %v7595_v38  ;;  %v5369_v10 = vpop.f32.mrf.mxu0  ;;  %5668 = vmatmul.mubr.msk.f32.gmra.mxu0 %vm247_vm0, %v7597_v20  ;;  %v4826_v13 = vld [vmem:[%s5909_s9 + $0x1a1] sm:$0xff] }
 0x12e   : > { %v5319_v0 = vpop.f32.mrf.mxu1  ;;  %5618 = vmatmul.mubr.msk.f32.gmra.mxu1 %vm247_vm0, %v7596_v8  ;;  %5670 = vmatprep.mubr.msk.f32.mxu0 %vm247_vm0, %v4886_v35 }
 0x12f   : > { %v6929_v2 = vadd.f32 %v1358_v5, %v1010_v53  ;;  %v1013_v11 = vadd.f32 %v5319_v0, %v7598_v55  ;;  %5620 = vmatprep.mubr.msk.f32.mxu1 %vm247_vm0, %v4821_v33  ;;  %v1368_v16 = vpop.f32.mrf.mxu0  ;;  %v4891_v5 = vld [vmem:[%s5909_s9 + $0x1a2] sm:$0xff]  ;;  %v7607_v53 = vld [vmem:[#allocation20_spill] sm:$0xff]  ;;  %v7608_v55 = vld [vmem:[#allocation21_spill] sm:$0xff]  ;;  %s7223_s9 = scalar_lea.vmem [#allocation3], %s4435_s6 }
 0x130   : > { %v917_v14 = vpop.f32.mrf.mxu1  ;;  %s4329_s11 = sshll.u32 %s7223_s9, 4  ;;  %s7369_s11 = int_to_ptr.vmem [resolvable:$true] %s4329_s11 }
 0x131   : > { %v6936_v28 = vadd.f32 %v5369_v10, %v1013_v11  ;;  %v1012_v7 = vadd.f32 %v917_v14, %v7599_v45  ;;  %v5372_v62 = vpop.f32.mrf.mxu0  ;;  %5671 = vmatmul.mubr.msk.f32.gmra.mxu0 %vm247_vm0, %v4887_v36  ;;  %s5739_s23 = scalar_lea.vmem %s7369_s11, 4096  ;;  %p5746_p1 = scmp.lt.s32.totalorder %s7369_s11, %s5744_s27 }
 0x132   : > { %v5322_v59 = vpop.f32.mrf.mxu1  ;;  %5621 = vmatmul.mubr.msk.f32.gmra.mxu1 %vm247_vm0, %v4822_v60  ;;  %5673 = vmatprep.mubr.msk.f32.mxu0 %vm247_vm0, %v7602_v63  ;;  %p5740_p12 = scmp.ne.s32.totalorder %s7369_s11, %s5739_s23  ;;  %p5747_p2 = scmp.lt.s32.totalorder %s5745_s28, %s5739_s23 }
 0x133   : > { %v6941_v17 = vadd.f32 %v1368_v16, %v1012_v7  ;;  %v1015_v40 = vadd.f32 %v5322_v59, %v7600_v19  ;;  %5623 = vmatprep.mubr.msk.f32.mxu1 %vm247_vm0, %v7601_v43  ;;  %v1378_v23 = vpop.f32.mrf.mxu0  ;;  %v7609_v16 = vld [vmem:[#allocation22_spill] sm:$0xff] }
 0x134   : > { %v927_v21 = vpop.f32.mrf.mxu1  ;;  %p5741_p13 = pnand %p5740_p12, %p5880_p4  ;;  %p5748_p3 = por %p5747_p2, %p5746_p1 }
 0x135   : > { %v6950_v3 = vadd.f32 %v5372_v62, %v1015_v40  ;;  %v1014_v27 = vadd.f32 %v927_v21, %v7603_v25  ;;  %v5375_v9 = vpop.f32.mrf.mxu0  ;;  %5674 = vmatmul.mubr.msk.f32.gmra.mxu0 %vm247_vm0, %v7605_v31 }
 0x136   : > { %v5325_v46 = vpop.f32.mrf.mxu1  ;;  %5624 = vmatmul.mubr.msk.f32.gmra.mxu1 %vm247_vm0, %v7604_v51  ;;  %5676 = vmatprep.mubr.msk.f32.mxu0 %vm247_vm0, %v4890_v1  ;;  %p5742_p0 = pneg %p5741_p13 }
 0x137   : > { %v6957_v24 = vadd.f32 %v1378_v23, %v1014_v27  ;;  %v1017_v39 = vadd.f32 %v5325_v46, %v7606_v42  ;;  %5626 = vmatprep.mubr.msk.f32.mxu1 %vm247_vm0, %v4825_v41  ;;  %v1388_v35 = vpop.f32.mrf.mxu0 }
 0x138   : > { %v937_v33 = vpop.f32.mrf.mxu1  ;;  %p5749_p5 = pnand %p5748_p3, %p5742_p0 }
 0x139   : > { %v6964_v38 = vadd.f32 %v5375_v9, %v1017_v39  ;;  %v1016_v0 = vadd.f32 %v937_v33, %v7607_v53  ;;  %v5378_v8 = vpop.f32.mrf.mxu0  ;;  %5677 = vmatmul.mubr.msk.f32.gmra.mxu0 %vm247_vm0, %v4891_v5 }
 0x13a   : > { %v5328_v10 = vpop.f32.mrf.mxu1  ;;  %5627 = vmatmul.mubr.msk.f32.gmra.mxu1 %vm247_vm0, %v4826_v13 }
 0x13b   : > { %v6969_v20 = vadd.f32 %v1388_v35, %v1016_v0  ;;  %v1019_v11 = vadd.f32 %v5328_v10, %v7608_v55  ;;  %v1398_v36 = vpop.f32.mrf.mxu0 }
 0x13c   : > { %v947_v60 = vpop.f32.mrf.mxu1 }
 0x13d   : > { %v6972_v14 = vadd.f32 %v5378_v8, %v1019_v11  ;;  %v1018_v45 = vadd.f32 %v947_v60, %v7609_v16  ;;  %v5433_v59 = vpop.f32.mrf.mxu0 }
 0x13e   : > { %v5383_v7 = vpop.f32.mrf.mxu1 }
 0x13f   : > { %v6975_v62 = vadd.f32 %v1398_v36, %v1018_v45  ;;  %v1892_v19 = vadd.f32 %v5383_v7, %v6766_v54  ;;  %v2151_v43 = vpop.f32.mrf.mxu0 }
 0x140   : > { %v1700_v40 = vpop.f32.mrf.mxu1 }
 0x141   : > { %v6978_v63 = vadd.f32 %v5433_v59, %v1892_v19  ;;  %v1891_v21 = vadd.f32 %v1700_v40, %v6773_v49  ;;  %v5436_v41 = vpop.f32.mrf.mxu0 }
 0x142   : > { %v5386_v23 = vpop.f32.mrf.mxu1 }
 0x143   : > { %v6981_v1 = vadd.f32 %v2151_v43, %v1891_v21  ;;  %v1894_v25 = vadd.f32 %v5386_v23, %v6780_v4  ;;  %v2161_v46 = vpop.f32.mrf.mxu0 }
 0x144   : > { %v1710_v27 = vpop.f32.mrf.mxu1 }
 0x145   : > { %v6984_v9 = vadd.f32 %v5436_v41, %v1894_v25  ;;  %v1893_v51 = vadd.f32 %v1710_v27, %v6787_v15  ;;  %v5439_v54 = vpop.f32.mrf.mxu0 }
 0x146   : > { %v5389_v31 = vpop.f32.mrf.mxu1 }
 0x147   : > { %v6987_v42 = vadd.f32 %v2161_v46, %v1893_v51  ;;  %v1896_v39 = vadd.f32 %v5389_v31, %v6794_v18  ;;  %v2171_v49 = vpop.f32.mrf.mxu0 }
 0x148   : > { %v1720_v13 = vpop.f32.mrf.mxu1 }
 0x149   : > { %v6990_v5 = vadd.f32 %v5439_v54, %v1896_v39  ;;  %v1895_v33 = vadd.f32 %v1720_v13, %v6801_v48  ;;  %v5442_v4 = vpop.f32.mrf.mxu0 }
 0x14a   : > { %v5392_v35 = vpop.f32.mrf.mxu1 }
 0x14b   : > { %v6993_v53 = vadd.f32 %v2171_v49, %v1895_v33  ;;  %v1898_v0 = vadd.f32 %v5392_v35, %v6808_v22  ;;  %v2181_v15 = vpop.f32.mrf.mxu0 }
 0x14c   : > { %v1730_v10 = vpop.f32.mrf.mxu1 }
 0x14d   : > { %v6996_v8 = vadd.f32 %v5442_v4, %v1898_v0  ;;  %v1897_v55 = vadd.f32 %v1730_v10, %v6815_v50  ;;  %v5445_v18 = vpop.f32.mrf.mxu0 }
 0x14e   : > { %v5395_v11 = vpop.f32.mrf.mxu1 }
 0x14f   : > { %v6999_v60 = vadd.f32 %v2181_v15, %v1897_v55  ;;  %v1900_v36 = vadd.f32 %v5395_v11, %v6822_v26  ;;  %v2191_v48 = vpop.f32.mrf.mxu0 }
 0x150   : > { %v1740_v16 = vpop.f32.mrf.mxu1 }
 0x151   : > { %v7002_v45 = vadd.f32 %v5445_v18, %v1900_v36  ;;  %v1899_v7 = vadd.f32 %v1740_v16, %v6829_v58  ;;  %v5448_v22 = vpop.f32.mrf.mxu0 }
 0x152   : > { %v5398_v59 = vpop.f32.mrf.mxu1 }
 0x153   : > { %v7005_v19 = vadd.f32 %v2191_v48, %v1899_v7  ;;  %v1902_v40 = vadd.f32 %v5398_v59, %v6836_v30  ;;  %v2201_v50 = vpop.f32.mrf.mxu0 }
 0x154   : > { %v1750_v43 = vpop.f32.mrf.mxu1 }
 0x155   : > { %v7008_v21 = vadd.f32 %v5448_v22, %v1902_v40  ;;  %v1901_v23 = vadd.f32 %v1750_v43, %v6843_v29  ;;  %v5451_v26 = vpop.f32.mrf.mxu0 }
 0x156   : > { %v5401_v41 = vpop.f32.mrf.mxu1 }
 0x157   : > { %v7011_v25 = vadd.f32 %v2201_v50, %v1901_v23  ;;  %v1904_v27 = vadd.f32 %v5401_v41, %v6850_v34  ;;  %v2211_v58 = vpop.f32.mrf.mxu0 }
 0x158   : > { %v1760_v46 = vpop.f32.mrf.mxu1 }
 0x159   : > { %v7014_v51 = vadd.f32 %v5451_v26, %v1904_v27  ;;  %v1903_v31 = vadd.f32 %v1760_v46, %v6857_v44  ;;  %v5454_v30 = vpop.f32.mrf.mxu0 }
 0x15a   : > { %v5404_v54 = vpop.f32.mrf.mxu1 }
 0x15b   : > { %v7017_v39 = vadd.f32 %v2211_v58, %v1903_v31  ;;  %v1906_v13 = vadd.f32 %v5404_v54, %v6864_v32  ;;  %v2221_v29 = vpop.f32.mrf.mxu0 }
 0x15c   : > { %v1770_v49 = vpop.f32.mrf.mxu1 }
 0x15d   : > { %v7020_v33 = vadd.f32 %v5454_v30, %v1906_v13  ;;  %v1905_v35 = vadd.f32 %v1770_v49, %v6871_v52  ;;  %v5457_v34 = vpop.f32.mrf.mxu0 }
 0x15e   : > { %v5407_v4 = vpop.f32.mrf.mxu1 }
 0x15f   : > { %v7023_v0 = vadd.f32 %v2221_v29, %v1905_v35  ;;  %v1908_v10 = vadd.f32 %v5407_v4, %v6878_v56  ;;  %v2231_v44 = vpop.f32.mrf.mxu0 }
 0x160   : > { %v1780_v15 = vpop.f32.mrf.mxu1 }
 0x161   : > { %v7026_v55 = vadd.f32 %v5457_v34, %v1908_v10  ;;  %v1907_v11 = vadd.f32 %v1780_v15, %v6885_v6  ;;  %v5460_v32 = vpop.f32.mrf.mxu0 }
 0x162   : > { %v5410_v18 = vpop.f32.mrf.mxu1 }
 0x163   : > { %v7029_v36 = vadd.f32 %v2231_v44, %v1907_v11  ;;  %v1910_v16 = vadd.f32 %v5410_v18, %v6892_v57  ;;  %v2241_v52 = vpop.f32.mrf.mxu0 }
 0x164   : > { %v1790_v48 = vpop.f32.mrf.mxu1 }
 0x165   : > { %v7032_v7 = vadd.f32 %v5460_v32, %v1910_v16  ;;  %v1909_v59 = vadd.f32 %v1790_v48, %v6899_v61  ;;  %v5463_v56 = vpop.f32.mrf.mxu0 }
 0x166   : > { %v5413_v22 = vpop.f32.mrf.mxu1 }
 0x167   : > { %7610 = vst [vmem:[#allocation23_spill] sm:$0xff] %v7032_v7  ;;  %v7035_v40 = vadd.f32 %v2241_v52, %v1909_v59  ;;  %v1912_v43 = vadd.f32 %v5413_v22, %v6906_v47  ;;  %v2251_v6 = vpop.f32.mrf.mxu0 }
 0x168   : > { %v1800_v50 = vpop.f32.mrf.mxu1 }
 0x169   : > { %7611 = vst [vmem:[#allocation24_spill] sm:$0xff] %v7035_v40  ;;  %v7038_v23 = vadd.f32 %v5463_v56, %v1912_v43  ;;  %v1911_v41 = vadd.f32 %v1800_v50, %v6913_v37  ;;  %v5466_v57 = vpop.f32.mrf.mxu0 }
 0x16a   : > { %v5416_v26 = vpop.f32.mrf.mxu1 }
 0x16b   : > { %7612 = vst [vmem:[#allocation25_spill] sm:$0xff] %v7038_v23  ;;  %v7041_v27 = vadd.f32 %v2251_v6, %v1911_v41  ;;  %v1914_v46 = vadd.f32 %v5416_v26, %v6922_v12  ;;  %v2261_v61 = vpop.f32.mrf.mxu0 }
 0x16c   : > { %v1810_v58 = vpop.f32.mrf.mxu1 }
 0x16d   : > { %7613 = vst [vmem:[#allocation26_spill] sm:$0xff] %v7041_v27  ;;  %v7044_v31 = vadd.f32 %v5466_v57, %v1914_v46  ;;  %v1913_v54 = vadd.f32 %v1810_v58, %v6929_v2  ;;  %v5469_v47 = vpop.f32.mrf.mxu0 }
 0x16e   : > { %v5419_v30 = vpop.f32.mrf.mxu1 }
 0x16f   : > { %7614 = vst [vmem:[#allocation27_spill] sm:$0xff] %v7044_v31  ;;  %v7047_v13 = vadd.f32 %v2261_v61, %v1913_v54  ;;  %v1916_v49 = vadd.f32 %v5419_v30, %v6936_v28  ;;  %v2271_v37 = vpop.f32.mrf.mxu0 }
 0x170   : > { %v1820_v29 = vpop.f32.mrf.mxu1 }
 0x171   : > { %7615 = vst [vmem:[#allocation41_spill] sm:$0xff] %v7047_v13  ;;  %v7050_v35 = vadd.f32 %v5469_v47, %v1916_v49  ;;  %v1915_v4 = vadd.f32 %v1820_v29, %v6941_v17  ;;  %v5472_v12 = vpop.f32.mrf.mxu0 }
 0x172   : > { %v5422_v34 = vpop.f32.mrf.mxu1 }
 0x173   : > { %7616 = vst [vmem:[#allocation42_spill] sm:$0xff] %v7050_v35  ;;  %v7053_v10 = vadd.f32 %v2271_v37, %v1915_v4  ;;  %v1918_v15 = vadd.f32 %v5422_v34, %v6950_v3  ;;  %v2281_v2 = vpop.f32.mrf.mxu0 }
 0x174   : > { %v1830_v44 = vpop.f32.mrf.mxu1 }
 0x175   : > { %7617 = vst [vmem:[#allocation28_spill] sm:$0xff] %v7053_v10  ;;  %v7056_v11 = vadd.f32 %v5472_v12, %v1918_v15  ;;  %v1917_v18 = vadd.f32 %v1830_v44, %v6957_v24  ;;  %v5475_v28 = vpop.f32.mrf.mxu0 }
 0x176   : > { %v5425_v32 = vpop.f32.mrf.mxu1 }
 0x177   : > { %7618 = vst [vmem:[#allocation7_spill] sm:$0xff] %v7056_v11  ;;  %v7059_v16 = vadd.f32 %v2281_v2, %v1917_v18  ;;  %v1920_v48 = vadd.f32 %v5425_v32, %v6964_v38  ;;  %v2291_v17 = vpop.f32.mrf.mxu0 }
 0x178   : > { %v1840_v52 = vpop.f32.mrf.mxu1 }
 0x179   : > { %7619 = vst [vmem:[#allocation29_spill] sm:$0xff] %v7059_v16  ;;  %v7062_v59 = vadd.f32 %v5475_v28, %v1920_v48  ;;  %v1919_v22 = vadd.f32 %v1840_v52, %v6969_v20  ;;  %v5478_v3 = vpop.f32.mrf.mxu0 }
 0x17a   : > { %v5428_v56 = vpop.f32.mrf.mxu1 }
 0x17b   : > { %7620 = vst [vmem:[#allocation30_spill] sm:$0xff] %v7062_v59  ;;  %v7065_v43 = vadd.f32 %v2291_v17, %v1919_v22  ;;  %v1922_v50 = vadd.f32 %v5428_v56, %v6972_v14  ;;  %v2301_v24 = vpop.f32.mrf.mxu0 }
 0x17c   : > { %v1850_v6 = vpop.f32.mrf.mxu1 }
 0x17d   : > { %7621 = vst [vmem:[#allocation8_spill] sm:$0xff] %v7065_v43  ;;  %v7068_v41 = vadd.f32 %v5478_v3, %v1922_v50  ;;  %v1921_v26 = vadd.f32 %v1850_v6, %v6975_v62  ;;  %v7071_v38 = vpop.f32.mrf.mxu0 }
 0x17e   : > { %v5483_v57 = vpop.f32.mrf.mxu1 }
 0x17f   : > { %7622 = vst [vmem:[#allocation31_spill] sm:$0xff] %v7068_v41  ;;  %v7073_v46 = vadd.f32 %v2301_v24, %v1921_v26  ;;  %v7075_v61 = vpop.f32.mrf.mxu0 }
 0x180   : > { %v2602_v58 = vpop.f32.mrf.mxu1 }
 0x181   : > { %7623 = vst [vmem:[#allocation32_spill] sm:$0xff] %v7073_v46  ;;  %v7079_v54 = vpop.f32.mrf.mxu0 }
 0x182   : > { %v7077_v20 = vpop.f32.mrf.mxu1 }
 0x183   : > { %v7083_v14 = vpop.f32.mrf.mxu0 }
 0x184   : > { %v7081_v30 = vpop.f32.mrf.mxu1 }
 0x185   : > { %v7087_v49 = vpop.f32.mrf.mxu0 }
 0x186   : > { %v7085_v47 = vpop.f32.mrf.mxu1 }
 0x187   : > { %v7091_v29 = vpop.f32.mrf.mxu0 }
 0x188   : > { %v7089_v62 = vpop.f32.mrf.mxu1 }
 0x189   : > { %v7095_v4 = vpop.f32.mrf.mxu0 }
 0x18a   : > { %v7093_v37 = vpop.f32.mrf.mxu1 }
 0x18b   : > { %v7099_v12 = vpop.f32.mrf.mxu0 }
 0x18c   : > { %v7097_v34 = vpop.f32.mrf.mxu1 }
 0x18d   : > { %v7103_v44 = vpop.f32.mrf.mxu0 }
 0x18e   : > { %v7101_v15 = vpop.f32.mrf.mxu1 }
 0x18f   : > { %v7107_v18 = vpop.f32.mrf.mxu0 }
 0x190   : > { %v7105_v2 = vpop.f32.mrf.mxu1 }
 0x191   : > { %v7111_v28 = vpop.f32.mrf.mxu0 }
 0x192   : > { %v7109_v32 = vpop.f32.mrf.mxu1 }
 0x193   : > { %v7115_v52 = vpop.f32.mrf.mxu0 }
 0x194   : > { %v7113_v48 = vpop.f32.mrf.mxu1 }
 0x195   : > { %v7119_v22 = vpop.f32.mrf.mxu0 }
 0x196   : > { %v7117_v17 = vpop.f32.mrf.mxu1 }
 0x197   : > { %v7123_v3 = vpop.f32.mrf.mxu0 }
 0x198   : > { %v7121_v56 = vpop.f32.mrf.mxu1 }
 0x199   : > { %v7127_v6 = vpop.f32.mrf.mxu0 }
 0x19a   : > { %v7125_v50 = vpop.f32.mrf.mxu1 }
 0x19b   : > { %v7131_v26 = vpop.f32.mrf.mxu0 }
 0x19c   : > { %v7129_v24 = vpop.f32.mrf.mxu1 }
 0x19d   : > { %v7135_v41 = vpop.f32.mrf.mxu0 }
 0x19e   : > { %v7133_v46 = vpop.f32.mrf.mxu1 }
 0x19f   : > { %v7139_v59 = vpop.f32.mrf.mxu0 }
 0x1a0   : > { %v7137_v43 = vpop.f32.mrf.mxu1  ;;  %7624 = vst [vmem:[#allocation9_spill] sm:$0xff] %v7139_v59 }
 0x1a1   : > { %v7143_v11 = vpop.f32.mrf.mxu0 }
 0x1a2   : > { %v7141_v16 = vpop.f32.mrf.mxu1  ;;  %7626 = vst [vmem:[#allocation34_spill] sm:$0xff] %v7143_v11 }
 0x1a3   : > { %7625 = vst [vmem:[#allocation33_spill] sm:$0xff] %v7141_v16  ;;  %v7147_v35 = vpop.f32.mrf.mxu0 }
 0x1a4   : > { %v7145_v10 = vpop.f32.mrf.mxu1  ;;  %7628 = vst [vmem:[#allocation35_spill] sm:$0xff] %v7147_v35 }
 0x1a5   : > { %7627 = vst [vmem:[#allocation10_spill] sm:$0xff] %v7145_v10  ;;  %v7151_v31 = vpop.f32.mrf.mxu0 }
 0x1a6   : > { %v7149_v13 = vpop.f32.mrf.mxu1  ;;  %7629 = vst [vmem:[#allocation36_spill] sm:$0xff] %v7151_v31 }
 0x1a7   : > { %v7155_v23 = vpop.f32.mrf.mxu0 }
 0x1a8   : > { %v7153_v27 = vpop.f32.mrf.mxu1  ;;  %7631 = vst [vmem:[#allocation37_spill] sm:$0xff] %v7155_v23 }
 0x1a9   : > { %7630 = vst [vmem:[#allocation11_spill] sm:$0xff] %v7153_v27  ;;  %v7159_v7 = vpop.f32.mrf.mxu0 }
 0x1aa   : > { %v7157_v40 = vpop.f32.mrf.mxu1  ;;  %7633 = vst [vmem:[#allocation12_spill] sm:$0xff] %v7159_v7 }
 0x1ab   : > { %7632 = vst [vmem:[#allocation38_spill] sm:$0xff] %v7157_v40  ;;  %v7163_v16 = vpop.f32.mrf.mxu0 }
 0x1ac   : > { %v7161_v59 = vpop.f32.mrf.mxu1  ;;  %7635 = vst [vmem:[#allocation40_spill] sm:$0xff] %v7163_v16 }
 0x1ad   : > { %7634 = vst [vmem:[#allocation39_spill] sm:$0xff] %v7161_v59  ;;  %v7167_v10 = vpop.f32.mrf.mxu0 }
 0x1ae   : > { %v7165_v11 = vpop.f32.mrf.mxu1  ;;  %7637 = vst [vmem:[#allocation14_spill] sm:$0xff] %v7167_v10 }
 0x1af   : > { %7636 = vst [vmem:[#allocation13_spill] sm:$0xff] %v7165_v11  ;;  %v7171_v31 = vpop.f32.mrf.mxu0 }
 0x1b0   : > { %v7169_v35 = vpop.f32.mrf.mxu1  ;;  %7639 = vst [vmem:[#allocation43_spill] sm:$0xff] %v7171_v31 }
 0x1b1   : > { %7638 = vst [vmem:[#allocation15_spill] sm:$0xff] %v7169_v35  ;;  %v7175_v23 = vpop.f32.mrf.mxu0  ;;  %v2794_v35 = vadd.f32 %v5483_v57, %v6978_v63  ;;  %v2795_v57 = vadd.f32 %v7081_v30, %v6987_v42  ;;  %v2797_v42 = vadd.f32 %v7089_v62, %v6993_v53 }
 0x1b2   : > { %v7173_v27 = vpop.f32.mrf.mxu1  ;;  %7641 = vst [vmem:[#allocation16_spill] sm:$0xff] %v7175_v23  ;;  %v2793_v23 = vadd.f32 %v2602_v58, %v6981_v1  ;;  %v2798_v1 = vadd.f32 %v7085_v47, %v6990_v5 }
 0x1b3   : > { %7640 = vst [vmem:[#allocation17_spill] sm:$0xff] %v7173_v27  ;;  %v7179_v7 = vpop.f32.mrf.mxu0 }
 0x1b4   : > { %v7177_v40 = vpop.f32.mrf.mxu1  ;;  %7643 = vst [vmem:[#allocation19_spill] sm:$0xff] %v7179_v7  ;;  %v3245_v63 = vadd.f32 %v7075_v61, %v2793_v23  ;;  %v3247_v61 = vadd.f32 %v7083_v14, %v2795_v57  ;;  %v2802_v57 = vadd.f32 %v7101_v15, %v7002_v45 }
 0x1b5   : > { %7642 = vst [vmem:[#allocation6_spill] sm:$0xff] %v7177_v40  ;;  %v7183_v16 = vpop.f32.mrf.mxu0 }
 0x1b6   : > { %v7181_v59 = vpop.f32.mrf.mxu1  ;;  %7645 = vst [vmem:[#allocation20_spill] sm:$0xff] %v7183_v16  ;;  %v3246_v16 = vadd.f32 %v7071_v38, %v2794_v35  ;;  %v7213_v35 = vld [vmem:[%s7423_s2] ss:$0 sm:$0xff] }
 0x1b7   : > { %7644 = vst [vmem:[#allocation18_spill] sm:$0xff] %v7181_v59  ;;  %v7187_v10 = vpop.f32.mrf.mxu0 }
 0x1b8   : > { %v7185_v11 = vpop.f32.mrf.mxu1  ;;  %7647 = vst [vmem:[#allocation22_spill] sm:$0xff] %v7187_v10 }
 0x1b9   : > { %7646 = vst [vmem:[#allocation21_spill] sm:$0xff] %v7185_v11  ;;  %v7192_v27 = vpop.f32.mrf.mxu0  ;;  %v2796_v11 = vadd.f32 %v7077_v20, %v6984_v9 }
 0x1ba   : > { %v7190_v31 = vpop.f32.mrf.mxu1  ;;  %7649 = vst [vmem:[#allocation45_spill] sm:$0xff] %v7192_v27 }
 0x1bb   : > { %7648 = vst [vmem:[#allocation44_spill] sm:$0xff] %v7190_v31  ;;  %v7197_v7 = vpop.f32.mrf.mxu0  ;;  %v3248_v58 = vadd.f32 %v7079_v54, %v2796_v11  ;;  %v2800_v11 = vadd.f32 %v7093_v37, %v6996_v8  ;;  %v3249_v54 = vadd.f32 %v7091_v29, %v2797_v42 }
 0x1bc   : > { %v7195_v40 = vpop.f32.mrf.mxu1  ;;  %7651 = vst [vmem:[#allocation47_spill] sm:$0xff] %v7197_v7  ;;  %v3250_v7 = vadd.f32 %v7087_v49, %v2798_v1  ;;  %v2799_v49 = vadd.f32 %v7097_v34, %v6999_v60  ;;  %v2801_v60 = vadd.f32 %v7105_v2, %v7005_v19 }
 0x1bd   : > { %7650 = vst [vmem:[#allocation46_spill] sm:$0xff] %v7195_v40  ;;  %v5633_v10 = vpop.f32.mrf.mxu0 }
 0x1be   : > { %v5583_v59 = vpop.f32.mrf.mxu1 }
 0x1bf   : > { %v3697_v27 = vadd.f32 %v5583_v59, %v3246_v16  ;;  %v3956_v9 = vpop.f32.mrf.mxu0 }
 0x1c0   : > { %v3505_v38 = vpop.f32.mrf.mxu1 }
 0x1c1   : > { %v4148_v20 = vadd.f32 %v5633_v10, %v3697_v27  ;;  %v3696_v23 = vadd.f32 %v3505_v38, %v3245_v63  ;;  %v5636_v59 = vpop.f32.mrf.mxu0 }
 0x1c2   : > { %v5586_v16 = vpop.f32.mrf.mxu1 }
 0x1c3   : > { %v4251_v5 = vadd.f32 %v7213_v35, %v4148_v20  ;;  %v4147_v30 = vadd.f32 %v3956_v9, %v3696_v23  ;;  %v3699_v47 = vadd.f32 %v5586_v16, %v3248_v58  ;;  %v3966_v31 = vpop.f32.mrf.mxu0  ;;  %v2804_v16 = vadd.f32 %v7109_v32, %v7008_v21 }
 0x1c4   : > { %v3515_v40 = vpop.f32.mrf.mxu1  ;;  %v2806_v21 = vadd.f32 %v7117_v17, %v7014_v51 }
 0x1c5   : > { %4283 = vst [vmem:[%s7223_s9 + $0x8] sm:$0xff] %v4251_v5  ;;  %v4250_v53 = vadd.f32 %v7213_v35, %v4147_v30  ;;  %v4150_v27 = vadd.f32 %v5636_v59, %v3699_v47  ;;  %v3698_v10 = vadd.f32 %v3515_v40, %v3247_v61  ;;  %v5639_v62 = vpop.f32.mrf.mxu0  ;;  %v3252_v40 = vadd.f32 %v7095_v4, %v2800_v11 }
 0x1c6   : > { %v5589_v14 = vpop.f32.mrf.mxu1  ;;  %v3254_v4 = vadd.f32 %v7103_v44, %v2802_v57  ;;  %v2803_v30 = vadd.f32 %v7113_v48, %v7011_v25  ;;  %v2805_v25 = vadd.f32 %v7121_v56, %v7017_v39 }
 0x1c7   : > { %4282 = vst [vmem:[%s7223_s9] sm:$0xff] %v4250_v53  ;;  %v4253_v8 = vadd.f32 %v7213_v35, %v4150_v27  ;;  %v4149_v37 = vadd.f32 %v3966_v31, %v3698_v10  ;;  %v3701_v63 = vadd.f32 %v5589_v14, %v3250_v7  ;;  %v3976_v38 = vpop.f32.mrf.mxu0  ;;  %v3251_v7 = vadd.f32 %v7099_v12, %v2799_v49 }
 0x1c8   : > { %v3525_v1 = vpop.f32.mrf.mxu1  ;;  %v3253_v12 = vadd.f32 %v7107_v18, %v2801_v60  ;;  %v3256_v27 = vadd.f32 %v7111_v28, %v2804_v16  ;;  %v3258_v28 = vadd.f32 %v7119_v22, %v2806_v21 }
 0x1c9   : > { %4285 = vst [vmem:[%s7223_s9 + $0x18] sm:$0xff] %v4253_v8  ;;  %v4252_v29 = vadd.f32 %v7213_v35, %v4149_v37  ;;  %v4152_v9 = vadd.f32 %v5639_v62, %v3701_v63  ;;  %v3700_v58 = vadd.f32 %v3525_v1, %v3249_v54  ;;  %v5642_v20 = vpop.f32.mrf.mxu0  ;;  %v3255_v62 = vadd.f32 %v7115_v52, %v2803_v30 }
 0x1ca   : > { %v5592_v34 = vpop.f32.mrf.mxu1  ;;  %v2808_v63 = vadd.f32 %v7125_v50, %v7020_v33  ;;  %v3257_v52 = vadd.f32 %v7123_v3, %v2805_v25  ;;  %v2810_v33 = vadd.f32 %v7133_v46, %v7026_v55 }
 0x1cb   : > { %4284 = vst [vmem:[%s7223_s9 + $0x10] sm:$0xff] %v4252_v29  ;;  %v4255_v45 = vadd.f32 %v7213_v35, %v4152_v9  ;;  %v4151_v31 = vadd.f32 %v3976_v38, %v3700_v58  ;;  %v3703_v15 = vadd.f32 %v5592_v34, %v3252_v40  ;;  %v3986_v42 = vpop.f32.mrf.mxu0  ;;  %v2807_v40 = vadd.f32 %v7129_v24, %v7023_v0 }
 0x1cc   : > { %v3535_v23 = vpop.f32.mrf.mxu1  ;;  %v3260_v60 = vadd.f32 %v7127_v6, %v2808_v63  ;;  %v2809_v0 = vadd.f32 %v7137_v43, %v7029_v36  ;;  %v3262_v6 = vadd.f32 %v7135_v41, %v2810_v33  ;;  %v7662_v63 = vld [vmem:[#allocation36_spill] sm:$0xff] }
 0x1cd   : > { %4287 = vst [vmem:[%s7223_s9 + $0x28] sm:$0xff] %v4255_v45  ;;  %v4254_v19 = vadd.f32 %v7213_v35, %v4151_v31  ;;  %v4154_v2 = vadd.f32 %v5642_v20, %v3703_v15  ;;  %v3702_v59 = vadd.f32 %v3535_v23, %v3251_v7  ;;  %v5645_v5 = vpop.f32.mrf.mxu0  ;;  %v3259_v45 = vadd.f32 %v7131_v26, %v2807_v40  ;;  %v7652_v23 = vld [vmem:[#allocation23_spill] sm:$0xff]  ;;  %v7654_v26 = vld [vmem:[#allocation9_spill] sm:$0xff] }
 0x1ce   : > { %v5595_v61 = vpop.f32.mrf.mxu1 }
 0x1cf   : > { %4286 = vst [vmem:[%s7223_s9 + $0x20] sm:$0xff] %v4254_v19  ;;  %v4257_v44 = vadd.f32 %v7213_v35, %v4154_v2  ;;  %v4153_v47 = vadd.f32 %v3986_v42, %v3702_v59  ;;  %v3705_v11 = vadd.f32 %v5595_v61, %v3254_v4  ;;  %v3996_v53 = vpop.f32.mrf.mxu0  ;;  %v7653_v42 = vld [vmem:[#allocation33_spill] sm:$0xff]  ;;  %v3261_v2 = vadd.f32 %v7654_v26, %v2809_v0  ;;  %v7655_v61 = vld [vmem:[#allocation24_spill] sm:$0xff] }
 0x1d0   : > { %v3545_v32 = vpop.f32.mrf.mxu1  ;;  %v2812_v16 = vadd.f32 %v7653_v42, %v7652_v23 }
 0x1d1   : > { %4289 = vst [vmem:[%s7223_s9 + $0x38] sm:$0xff] %v4257_v44  ;;  %v4256_v18 = vadd.f32 %v7213_v35, %v4153_v47  ;;  %v4156_v10 = vadd.f32 %v5645_v5, %v3705_v11  ;;  %v3704_v54 = vadd.f32 %v3545_v32, %v3253_v12  ;;  %v5648_v14 = vpop.f32.mrf.mxu0  ;;  %v7656_v5 = vld [vmem:[#allocation10_spill] sm:$0xff]  ;;  %v7657_v11 = vld [vmem:[#allocation25_spill] sm:$0xff] }
 0x1d2   : > { %v5598_v48 = vpop.f32.mrf.mxu1  ;;  %v2811_v30 = vadd.f32 %v7656_v5, %v7655_v61  ;;  %v2814_v21 = vadd.f32 %v7149_v13, %v7657_v11  ;;  %v7675_v11 = vld [vmem:[#allocation7_spill] sm:$0xff] }
 0x1d3   : > { %4288 = vst [vmem:[%s7223_s9 + $0x30] sm:$0xff] %v4256_v18  ;;  %v4259_v51 = vadd.f32 %v7213_v35, %v4156_v10  ;;  %v4155_v17 = vadd.f32 %v3996_v53, %v3704_v54  ;;  %v3707_v49 = vadd.f32 %v5598_v48, %v3256_v27  ;;  %v4006_v37 = vpop.f32.mrf.mxu0  ;;  %v7658_v27 = vld [vmem:[#allocation34_spill] sm:$0xff] }
 0x1d4   : > { %v3555_v8 = vpop.f32.mrf.mxu1  ;;  %v3264_v18 = vadd.f32 %v7658_v27, %v2812_v16  ;;  %v7659_v48 = vld [vmem:[#allocation26_spill] sm:$0xff]  ;;  %v7671_v16 = vld [vmem:[#allocation28_spill] sm:$0xff] }
 0x1d5   : > { %4291 = vst [vmem:[%s7223_s9 + $0x48] sm:$0xff] %v4259_v51  ;;  %v4258_v39 = vadd.f32 %v7213_v35, %v4155_v17  ;;  %v4158_v56 = vadd.f32 %v5648_v14, %v3707_v49  ;;  %v3706_v57 = vadd.f32 %v3555_v8, %v3255_v62  ;;  %v5651_v38 = vpop.f32.mrf.mxu0  ;;  %v7660_v14 = vld [vmem:[#allocation11_spill] sm:$0xff] }
 0x1d6   : > { %v5601_v1 = vpop.f32.mrf.mxu1  ;;  %v2813_v62 = vadd.f32 %v7660_v14, %v7659_v48  ;;  %v7661_v49 = vld [vmem:[#allocation35_spill] sm:$0xff]  ;;  %v7678_v14 = vld [vmem:[#allocation29_spill] sm:$0xff] }
 0x1d7   : > { %4290 = vst [vmem:[%s7223_s9 + $0x40] sm:$0xff] %v4258_v39  ;;  %v4261_v22 = vadd.f32 %v7213_v35, %v4158_v56  ;;  %v4157_v29 = vadd.f32 %v4006_v37, %v3706_v57  ;;  %v3709_v9 = vadd.f32 %v5601_v1, %v3258_v28  ;;  %v4016_v58 = vpop.f32.mrf.mxu0  ;;  %v3263_v28 = vadd.f32 %v7661_v49, %v2811_v30  ;;  %v7664_v1 = vld [vmem:[#allocation38_spill] sm:$0xff] }
 0x1d8   : > { %v3565_v50 = vpop.f32.mrf.mxu1  ;;  %v3266_v39 = vadd.f32 %v7662_v63, %v2814_v21  ;;  %v7674_v30 = vld [vmem:[#allocation14_spill] sm:$0xff]  ;;  %v7676_v21 = vld [vmem:[#allocation17_spill] sm:$0xff] }
 0x1d9   : > { %4293 = vst [vmem:[%s7223_s9 + $0x58] sm:$0xff] %v4261_v22  ;;  %v4260_v3 = vadd.f32 %v7213_v35, %v4157_v29  ;;  %v4160_v34 = vadd.f32 %v5651_v38, %v3709_v9  ;;  %v3708_v20 = vadd.f32 %v3565_v50, %v3257_v52  ;;  %v5654_v7 = vpop.f32.mrf.mxu0  ;;  %v7663_v52 = vld [vmem:[#allocation27_spill] sm:$0xff]  ;;  %v7665_v9 = vld [vmem:[#allocation37_spill] sm:$0xff] }
 0x1da   : > { %v5604_v24 = vpop.f32.mrf.mxu1  ;;  %v2816_v38 = vadd.f32 %v7664_v1, %v7663_v52  ;;  %v3265_v33 = vadd.f32 %v7665_v9, %v2813_v62  ;;  %v7679_v62 = vld [vmem:[#allocation6_spill] sm:$0xff] }
 0x1db   : > { %4292 = vst [vmem:[%s7223_s9 + $0x50] sm:$0xff] %v4260_v3  ;;  %v4263_v55 = vadd.f32 %v7213_v35, %v4160_v34  ;;  %v4159_v46 = vadd.f32 %v4016_v58, %v3708_v20  ;;  %v3711_v31 = vadd.f32 %v5604_v24, %v3260_v60  ;;  %v4026_v4 = vpop.f32.mrf.mxu0  ;;  %v7666_v60 = vld [vmem:[#allocation41_spill] sm:$0xff]  ;;  %v7667_v3 = vld [vmem:[#allocation39_spill] sm:$0xff] }
 0x1dc   : > { %v3575_v15 = vpop.f32.mrf.mxu1  ;;  %v2815_v34 = vadd.f32 %v7667_v3, %v7666_v60 }
 0x1dd   : > { %4295 = vst [vmem:[%s7223_s9 + $0x68] sm:$0xff] %v4263_v55  ;;  %v4262_v36 = vadd.f32 %v7213_v35, %v4159_v46  ;;  %v4162_v43 = vadd.f32 %v5654_v7, %v3711_v31  ;;  %v3710_v19 = vadd.f32 %v3575_v15, %v3259_v45  ;;  %v5657_v12 = vpop.f32.mrf.mxu0  ;;  %v7668_v7 = vld [vmem:[#allocation42_spill] sm:$0xff]  ;;  %v7669_v45 = vld [vmem:[#allocation13_spill] sm:$0xff] }
 0x1de   : > { %v5607_v59 = vpop.f32.mrf.mxu1  ;;  %v2818_v55 = vadd.f32 %v7669_v45, %v7668_v7  ;;  %v7687_v45 = vld [vmem:[#allocation31_spill] sm:$0xff] }
 0x1df   : > { %4294 = vst [vmem:[%s7223_s9 + $0x60] sm:$0xff] %v4262_v36  ;;  %v4265_v41 = vadd.f32 %v7213_v35, %v4162_v43  ;;  %v4161_v44 = vadd.f32 %v4026_v4, %v3710_v19  ;;  %v3713_v47 = vadd.f32 %v5607_v59, %v3262_v6  ;;  %v4036_v53 = vpop.f32.mrf.mxu0  ;;  %v7670_v6 = vld [vmem:[#allocation12_spill] sm:$0xff]  ;;  %v7672_v36 = vld [vmem:[#allocation15_spill] sm:$0xff] }
 0x1e0   : > { %v3585_v32 = vpop.f32.mrf.mxu1  ;;  %v3268_v15 = vadd.f32 %v7670_v6, %v2816_v38  ;;  %v2817_v43 = vadd.f32 %v7672_v36, %v7671_v16  ;;  %v7690_v36 = vld [vmem:[#allocation32_spill] sm:$0xff] }
 0x1e1   : > { %4297 = vst [vmem:[%s7223_s9 + $0x78] sm:$0xff] %v4265_v41  ;;  %v4264_v10 = vadd.f32 %v7213_v35, %v4161_v44  ;;  %v4164_v54 = vadd.f32 %v5657_v12, %v3713_v47  ;;  %v3712_v25 = vadd.f32 %v3585_v32, %v3261_v2  ;;  %v5660_v17 = vpop.f32.mrf.mxu0  ;;  %v7673_v2 = vld [vmem:[#allocation40_spill] sm:$0xff]  ;;  %v3270_v41 = vadd.f32 %v7674_v30, %v2818_v55 }
 0x1e2   : > { %v5610_v51 = vpop.f32.mrf.mxu1  ;;  %v3267_v59 = vadd.f32 %v7673_v2, %v2815_v34  ;;  %v2820_v32 = vadd.f32 %v7676_v21, %v7675_v11  ;;  %v7688_v55 = vld [vmem:[#allocation44_spill] sm:$0xff] }
 0x1e3   : > { %4296 = vst [vmem:[%s7223_s9 + $0x70] sm:$0xff] %v4264_v10  ;;  %v4267_v13 = vadd.f32 %v7213_v35, %v4164_v54  ;;  %v4163_v8 = vadd.f32 %v4036_v53, %v3712_v25  ;;  %v3715_v37 = vadd.f32 %v5610_v51, %v3264_v18  ;;  %v4046_v57 = vpop.f32.mrf.mxu0  ;;  %v7677_v10 = vld [vmem:[#allocation43_spill] sm:$0xff]  ;;  %v2819_v51 = vadd.f32 %v7679_v62, %v7678_v14 }
 0x1e4   : > { %v3595_v56 = vpop.f32.mrf.mxu1  ;;  %v3269_v54 = vadd.f32 %v7677_v10, %v2817_v43  ;;  %v7691_v43 = vld [vmem:[#allocation46_spill] sm:$0xff] }
 0x1e5   : > { %4299 = vst [vmem:[%s7223_s9 + $0x88] sm:$0xff] %v4267_v13  ;;  %v4266_v40 = vadd.f32 %v7213_v35, %v4163_v8  ;;  %v4166_v22 = vadd.f32 %v5660_v17, %v3715_v37  ;;  %v3714_v29 = vadd.f32 %v3595_v56, %v3263_v28  ;;  %v5663_v58 = vpop.f32.mrf.mxu0  ;;  %v7680_v13 = vld [vmem:[#allocation30_spill] sm:$0xff]  ;;  %v7682_v56 = vld [vmem:[#allocation16_spill] sm:$0xff] }
 0x1e6   : > { %v5613_v50 = vpop.f32.mrf.mxu1  ;;  %v7681_v8 = vld [vmem:[#allocation18_spill] sm:$0xff] }
 0x1e7   : > { %4298 = vst [vmem:[%s7223_s9 + $0x80] sm:$0xff] %v4266_v40  ;;  %v4269_v20 = vadd.f32 %v7213_v35, %v4166_v22  ;;  %v4165_v0 = vadd.f32 %v4046_v57, %v3714_v29  ;;  %v3717_v24 = vadd.f32 %v5613_v50, %v3266_v39  ;;  %v4056_v31 = vpop.f32.mrf.mxu0  ;;  %v2822_v37 = vadd.f32 %v7681_v8, %v7680_v13  ;;  %v7683_v40 = vld [vmem:[#allocation8_spill] sm:$0xff]  ;;  %v7684_v22 = vld [vmem:[#allocation21_spill] sm:$0xff]  ;;  %v7685_v50 = vld [vmem:[#allocation19_spill] sm:$0xff] }
 0x1e8   : > { %v3605_v46 = vpop.f32.mrf.mxu1  ;;  %v3272_v57 = vadd.f32 %v7682_v56, %v2820_v32  ;;  %v2821_v29 = vadd.f32 %v7684_v22, %v7683_v40  ;;  %v7693_v32 = vld [vmem:[#allocation47_spill] sm:$0xff] }
 0x1e9   : > { %4301 = vst [vmem:[%s7223_s9 + $0x98] sm:$0xff] %v4269_v20  ;;  %v4268_v4 = vadd.f32 %v7213_v35, %v4165_v0  ;;  %v4168_v23 = vadd.f32 %v5663_v58, %v3717_v24  ;;  %v3716_v42 = vadd.f32 %v3605_v46, %v3265_v33  ;;  %v5666_v26 = vpop.f32.mrf.mxu0  ;;  %v3271_v58 = vadd.f32 %v7685_v50, %v2819_v51  ;;  %v7686_v20 = vld [vmem:[#allocation20_spill] sm:$0xff] }
 0x1ea   : > { %v5616_v19 = vpop.f32.mrf.mxu1  ;;  %v3274_v0 = vadd.f32 %v7686_v20, %v2822_v37  ;;  %v2824_v46 = vadd.f32 %v7688_v55, %v7687_v45 }
 0x1eb   : > { %4300 = vst [vmem:[%s7223_s9 + $0x90] sm:$0xff] %v4268_v4  ;;  %v4271_v12 = vadd.f32 %v7213_v35, %v4168_v23  ;;  %v4167_v61 = vadd.f32 %v4056_v31, %v3716_v42  ;;  %v3719_v5 = vadd.f32 %v5616_v19, %v3268_v15  ;;  %v4066_v47 = vpop.f32.mrf.mxu0  ;;  %v7689_v4 = vld [vmem:[#allocation22_spill] sm:$0xff]  ;;  %v2823_v19 = vadd.f32 %v7691_v43, %v7690_v36 }
 0x1ec   : > { %v3615_v44 = vpop.f32.mrf.mxu1  ;;  %v3273_v23 = vadd.f32 %v7689_v4, %v2821_v29 }
 0x1ed   : > { %4303 = vst [vmem:[%s7223_s9 + $0xa8] sm:$0xff] %v4271_v12  ;;  %v4270_v53 = vadd.f32 %v7213_v35, %v4167_v61  ;;  %v4170_v27 = vadd.f32 %v5666_v26, %v3719_v5  ;;  %v3718_v18 = vadd.f32 %v3615_v44, %v3267_v59  ;;  %v5669_v48 = vpop.f32.mrf.mxu0  ;;  %v7692_v5 = vld [vmem:[#allocation45_spill] sm:$0xff] }
 0x1ee   : > { %v5619_v25 = vpop.f32.mrf.mxu1  ;;  %v3276_v30 = vadd.f32 %v7692_v5, %v2824_v46 }
 0x1ef   : > { %4302 = vst [vmem:[%s7223_s9 + $0xa0] sm:$0xff] %v4270_v53  ;;  %v4273_v17 = vadd.f32 %v7213_v35, %v4170_v27  ;;  %v4169_v49 = vadd.f32 %v4066_v47, %v3718_v18  ;;  %v3721_v28 = vadd.f32 %v5619_v25, %v3270_v41  ;;  %v4076_v39 = vpop.f32.mrf.mxu0  ;;  %v3275_v53 = vadd.f32 %v7693_v32, %v2823_v19 }
 0x1f0   : > { %v3625_v63 = vpop.f32.mrf.mxu1 }
 0x1f1   : > { %4305 = vst [vmem:[%s7223_s9 + $0xb8] sm:$0xff] %v4273_v17  ;;  %v4272_v52 = vadd.f32 %v7213_v35, %v4169_v49  ;;  %v4172_v1 = vadd.f32 %v5669_v48, %v3721_v28  ;;  %v3720_v38 = vadd.f32 %v3625_v63, %v3269_v54  ;;  %v5672_v33 = vpop.f32.mrf.mxu0 }
 0x1f2   : > { %v5622_v9 = vpop.f32.mrf.mxu1 }
 0x1f3   : > { %4304 = vst [vmem:[%s7223_s9 + $0xb0] sm:$0xff] %v4272_v52  ;;  %v4275_v60 = vadd.f32 %v7213_v35, %v4172_v1  ;;  %v4171_v3 = vadd.f32 %v4076_v39, %v3720_v38  ;;  %v3723_v34 = vadd.f32 %v5622_v9, %v3272_v57  ;;  %v4086_v7 = vpop.f32.mrf.mxu0 }
 0x1f4   : > { %v3635_v24 = vpop.f32.mrf.mxu1 }
 0x1f5   : > { %4307 = vst [vmem:[%s7223_s9 + $0xc8] sm:$0xff] %v4275_v60  ;;  %v4274_v31 = vadd.f32 %v7213_v35, %v4171_v3  ;;  %v4174_v6 = vadd.f32 %v5672_v33, %v3723_v34  ;;  %v3722_v15 = vadd.f32 %v3635_v24, %v3271_v58  ;;  %v5675_v16 = vpop.f32.mrf.mxu0 }
 0x1f6   : > { %v5625_v42 = vpop.f32.mrf.mxu1 }
 0x1f7   : > { %4306 = vst [vmem:[%s7223_s9 + $0xc0] sm:$0xff] %v4274_v31  ;;  %v4277_v26 = vadd.f32 %v7213_v35, %v4174_v6  ;;  %v4173_v2 = vadd.f32 %v4086_v7, %v3722_v15  ;;  %v3725_v59 = vadd.f32 %v5625_v42, %v3274_v0  ;;  %v4096_v61 = vpop.f32.mrf.mxu0 }
 0x1f8   : > { %v3645_v12 = vpop.f32.mrf.mxu1 }
 0x1f9   : > { %4309 = vst [vmem:[%s7223_s9 + $0xd8] sm:$0xff] %v4277_v26  ;;  %v4276_v41 = vadd.f32 %v7213_v35, %v4173_v2  ;;  %v4176_v44 = vadd.f32 %v5675_v16, %v3725_v59  ;;  %v3724_v47 = vadd.f32 %v3645_v12, %v3273_v23  ;;  %v5678_v21 = vpop.f32.mrf.mxu0 }
 0x1fa   : > { %v5628_v11 = vpop.f32.mrf.mxu1 }
 0x1fb   : > { %4308 = vst [vmem:[%s7223_s9 + $0xd0] sm:$0xff] %v4276_v41  ;;  %v4279_v27 = vadd.f32 %v7213_v35, %v4176_v44  ;;  %v4175_v18 = vadd.f32 %v4096_v61, %v3724_v47  ;;  %v3727_v10 = vadd.f32 %v5628_v11, %v3276_v30  ;;  %v4106_v62 = vpop.f32.mrf.mxu0 }
 0x1fc   : > { %v3655_v54 = vpop.f32.mrf.mxu1 }
 0x1fd   : > { %4311 = vst [vmem:[%s7223_s9 + $0xe8] sm:$0xff] %v4279_v27  ;;  %v4278_v25 = vadd.f32 %v7213_v35, %v4175_v18  ;;  %v4178_v48 = vadd.f32 %v5678_v21, %v3727_v10  ;;  %v3726_v14 = vadd.f32 %v3655_v54, %v3275_v53 }
 0x1ff   : > { %4310 = vst [vmem:[%s7223_s9 + $0xe0] sm:$0xff] %v4278_v25  ;;  %v4281_v51 = vadd.f32 %v7213_v35, %v4178_v48  ;;  %v4177_v17 = vadd.f32 %v4106_v62, %v3726_v14 }
 0x201   : > { %4313 = vst [vmem:[%s7223_s9 + $0xf8] sm:$0xff] %v4281_v51  ;;  %v4280_v49 = vadd.f32 %v7213_v35, %v4177_v17 }
 0x203   : > { %4312 = vst [vmem:[%s7223_s9 + $0xf0] sm:$0xff] %v4280_v49 }
 0x204   : > { %5752 = shalt.err (!%p5749_p5)
}
 0x205   : > { %s5753_s29 = scalar_lea.hbm %s7367_s21, 4096  ;;  %s5757_s5 = scalar_lea.hbm %s7424_s3, 8192 }
 0x206   : > { %p5754_p6 = scmp.ne.s32.totalorder %s7367_s21, %s5753_s29  ;;  %p5758_p10 = scmp.lt.s32.totalorder %s7367_s21, %s7424_s3 }
 0x207   : > { %p5759_p11 = scmp.lt.s32.totalorder %s5757_s5, %s5753_s29 }
 0x208   : > { %p5755_p7 = pnand %p5754_p6, %p5880_p4 }
 0x209   : > { %p5760_p12 = por %p5759_p11, %p5758_p10 }
 0x20a   : > { %p5756_p9 = pneg %p5755_p7 }
 0x20c   : > { %p5761_p13 = pnand %p5760_p12, %p5756_p9 }
 0x20e   : > { %5764 = shalt.err (!%p5761_p13)
}
 0x20f   : > { %s5818_s8 = smov 128   ;;  %s5819_s9 = smov 8  }
 0x210   : > { %5682 = dma.vmem_to_hbm [thread:$0]  (%p5880_p4), %s7369_s11, 4096, %s7367_s21, %s7376_s15, %s5818_s8, %s5818_s8, %s5819_s9  }
 0x211 PF: > { %p5688_p0 = scmp.ge.s32.totalorder %s5815_s17, 2  ;;  %s4344_s10 = sand.u32 1, %s5795_s12  }
 0x212   : > { %s4345_s18 = scalar_lea.sflag [#allocation4], %s4344_s10 }
 0x213   : > { %p5685_p1 = pnand %p5688_p0, %p5887_p8 }
 0x215   : > { %p5686_p2 = pneg %p5685_p1 }
 0x217   : > { %5790 = dma.done.wait (%p5686_p2), %s4345_s18, 4096  }
 0x218   : > { %5792 = vsyncadd (%p5686_p2), %s4345_s18, 4294963200  ;;  %s16_s17 = sadd.s32 1, %s5815_s17   ;;  %s7694_s12 = smov %s5799_s13 }
 0x219   : > { %p13_p3 = scmp.ge.s32.totalorder %s16_s17, 4   ;;  %s7695_s13 = smov %s5803_s14 }
 0x21a   : > { %s7696_s14 = smov %s5893_s25  ;;  %s7697_s15 = smov %s5811_s16 }
 0x21b   : > { %s7698_s16 = smov %s7700_s20  ;;  %15 = sbr.rel (!%p13_p3) target bundleno = 4 (0x4), region = 83 }
 0x220   :  { %4350 = vsyncpa [#allocation4], 1 }
 0x221   :  { %4352 = vsyncpa [#allocation4 + $0x1], 1 }

</bundles_post_ra>
